<compile_context>
chip_gen: v6e
topology: v6e:2x2x1
jax: 0.10.0
libtpu: 0.0.40
codegen_flags: <defaults>
</compile_context>

<pallas_src>
import functools

import jax
import jax.numpy as jnp
from jax.experimental import pallas as pl
from jax.experimental.pallas import tpu as pltpu


def _round_up(x, m):
    return (x + m - 1) // m * m


def _sigmoid_1eup(x):
    # sigmoid(x) == 0.5 * tanh(0.5 * x) + 0.5  -> one EUP op instead of exp + reciprocal.
    return 0.5 * jnp.tanh(0.5 * x) + 0.5


def _lstm_recurrence_kernel(*refs, tt, hp, fuse_post):
    """Sequential LSTM recurrence over one (batch-block, time-tile) grid cell.

    refs (fuse_post=True):  zx, w_hh(HBM), w_post, y_out, whh_sc, h_sc, c_sc, dma_sem
    refs (fuse_post=False): zx, w_hh(HBM),         hs_out, whh_sc, h_sc, c_sc, dma_sem

    zx    : (TT, BB, 4*Hp)  precomputed x_t @ W_x + fused bias (gate-padded, bf16 or f32)
    w_hh  : (Hp, 4*Hp)      recurrent weight in HBM (transposed, gate-padded, bf16 or f32)
    y_out : (TT, BB)        fused post-projection output tile      (fuse_post=True)
    hs_out: (TT, BB, Hp)    lane-dense hidden-state output tile    (fuse_post=False)
    """
    if fuse_post:
        zx_ref, whh_hbm, wpost_ref, out_ref, whh_sc, h_sc, c_sc, dma_sem = refs
    else:
        zx_ref, whh_hbm, out_ref, whh_sc, h_sc, c_sc, dma_sem = refs
        wpost_ref = None

    t_blk = pl.program_id(1)

    @pl.when(t_blk == 0)
    def _init():
        # Single-buffered resident copy of the constant W_hh (manual DMA avoids the default
        # pipeline double-buffer for a block whose index never changes).  Re-copied once per
        # batch block so each megacore shard owns its own copy (cheap vs the z_x stream).
        cp = pltpu.make_async_copy(whh_hbm, whh_sc, dma_sem)
        cp.start()
        cp.wait()
        # h0 = c0 = 0 at the start of every batch block (time is the inner, sequential axis).
        h_sc[...] = jnp.zeros_like(h_sc)
        c_sc[...] = jnp.zeros_like(c_sc)

    w_hh = whh_sc[...]                     # (Hp, 4Hp), matmul dtype (bf16 by default)
    mm_dtype = w_hh.dtype
    w_post = wpost_ref[...] if fuse_post else None   # (1, Hp) f32

    def step(s, carry):
        h_prev, c_prev = carry             # f32 (BB, Hp) values: stay in vregs, no VMEM trips
        z = zx_ref[s].astype(jnp.float32) + jnp.dot(
            h_prev.astype(mm_dtype), w_hh, preferred_element_type=jnp.float32)
        # PyTorch gate order i, f, g, o.  Slices are 128-lane aligned since Hp % 128 == 0.
        i_g = _sigmoid_1eup(z[:, 0 * hp:1 * hp])
        f_g = _sigmoid_1eup(z[:, 1 * hp:2 * hp])
        g_g = jnp.tanh(z[:, 2 * hp:3 * hp])
        o_g = _sigmoid_1eup(z[:, 3 * hp:4 * hp])
        c_new = f_g * c_prev + i_g * g_g
        h_new = o_g * jnp.tanh(c_new)
        if fuse_post:
            # Fused post Linear (H -> 1): lane reduce (XLU, otherwise-idle slot) -> one
            # (1, BB) row of the lane-dense (TT, BB) output tile.
            y_row = jnp.sum(h_new * w_post, axis=-1)        # (BB,)
            out_ref[pl.ds(s, 1), :] = y_row[None, :]
        else:
            out_ref[s] = h_new
        return (h_new, c_new)

    h_last, c_last = jax.lax.fori_loop(
        0, tt, step, (h_sc[...], c_sc[...]), unroll=True)
    # Cross-time-tile carry: one scratch write per TT steps instead of per step.
    h_sc[...] = h_last
    c_sc[...] = c_last


def _choose_batch_block(B, max_batch_block):
    """Return (Bp, BB, fuse_post).  BB evenly divides Bp; BB is a multiple of 128 when the
    batch allows it (lane-dense fused post output); >= 2 blocks once Bp >= 256 so both v7x
    TensorCores get work on the 'parallel' batch axis."""
    Bp8 = _round_up(B, 8)
    if Bp8 < 128:
        return Bp8, Bp8, False              # tiny batch: single sublane-aligned block
    Bp = _round_up(Bp8, 128)
    units = Bp // 128
    cap_units = max(1, min(max_batch_block, Bp) // 128)
    best_u = 1
    for u in range(1, units + 1):
        if units % u != 0 or u > cap_units:
            continue
        if Bp >= 256 and units // u < 2:    # keep >= 2 batch blocks for 2-TC chips
            continue
        best_u = u
    return Bp, best_u * 128, True


def lstm_estimator_forward(x, params, *, time_tile=16, max_batch_block=256,
                           matmul_dtype=jnp.bfloat16, zx_dtype=jnp.bfloat16):
    """x: (B, T, input_dim) float32 -> (B, T) float32  (LSTMEstimator.forward).

    matmul_dtype / zx_dtype: dtype of the recurrent weight+hidden matmul inputs and of the
    precomputed z_x HBM stream (f32 accumulation and f32 gates regardless).  Pass jnp.float32
    for bit-conservative numerics.
    """
    B, T, N = x.shape
    F = params["w_pre"].shape[0]
    H = params["w_hh"].shape[1]
    Hp = _round_up(H, 128)                  # lane-align hidden dim (gate offsets = k*Hp)
    f32 = jnp.float32

    Bp, BB, fuse_post = _choose_batch_block(B, max_batch_block)
    TT = max(8, _round_up(min(time_tile, T), 8))

    # ---- VMEM-budget-aware tile fit (~85% of per-core capacity; v7x only has 64 MiB) ----
    try:
        vmem_cap = int(pltpu.get_tpu_info().vmem_capacity_bytes)
    except Exception:
        vmem_cap = 64 * 1024 * 1024         # conservative (v7x-sized) fallback
    budget = int(0.85 * vmem_cap)
    zx_b = jnp.dtype(zx_dtype).itemsize
    mm_b = jnp.dtype(matmul_dtype).itemsize

    def _vmem_est(tt, bb):
        return (2 * tt * bb * 4 * Hp * zx_b                    # pipelined z_x tiles (x2 bufs)
                + 2 * tt * bb * (1 if fuse_post else Hp) * 4   # pipelined output tiles
                + Hp * 4 * Hp * mm_b                           # resident W_hh (single buffer)
                + 2 * bb * Hp * 4                              # h/c scratch
                + (2 * Hp * 4 if fuse_post else 0))            # w_post

    while TT > 8 and _vmem_est(TT, BB) > budget:
        TT = max(8, (TT // 2) // 8 * 8)
    if fuse_post and BB > 128 and _vmem_est(TT, BB) > budget:
        BB = 128                                               # 128 always divides Bp here
    Tp = _round_up(max(T, TT), TT)
    n_b_blocks = Bp // BB
    n_t_blocks = Tp // TT

    # ---- parameter prep ----
    w_ih_t = params["w_ih"].astype(f32).T                      # (F, 4H)
    w_hh_t = params["w_hh"].astype(f32).T                      # (H, 4H)
    b_lstm = params["b_ih"].astype(f32) + params["b_hh"].astype(f32)

    def pad_gate_cols(m):
        # Pad each of the 4 gate blocks (..., H) -> (..., Hp) independently so gate boundaries
        # land on 128-lane tile boundaries inside the kernel.  Padded h/c columns stay exactly
        # 0 through the recurrence (zero weights/bias -> g_pad = 0, c_pad = 0, h_pad = 0).
        parts = [m[..., k * H:(k + 1) * H] for k in range(4)]
        pad = [(0, 0)] * (m.ndim - 1) + [(0, Hp - H)]
        return jnp.concatenate([jnp.pad(p, pad) for p in parts], axis=-1)

    # ---- x-path precompute: one big parallel matmul outside the recurrence ----
    x_tm = jnp.transpose(x.astype(f32), (1, 0, 2))             # (T, B, N)
    if N * 4 * H <= N * F + F * 4 * H:
        # Folding the pre Linear into W_ih does not increase FLOPs -> fold (exact algebra).
        w_x = params["w_pre"].astype(f32).T @ w_ih_t           # (N, 4H)
        b_x = params["b_pre"].astype(f32) @ w_ih_t + b_lstm    # (4H,)
        zx = (jnp.einsum("tbn,nh->tbh", x_tm, pad_gate_cols(w_x))
              + pad_gate_cols(b_x[None, :])[0])
    else:
        pre = (jnp.einsum("tbn,fn->tbf", x_tm, params["w_pre"].astype(f32))
               + params["b_pre"].astype(f32))
        zx = (jnp.einsum("tbf,fh->tbh", pre, pad_gate_cols(w_ih_t))
              + pad_gate_cols(b_lstm[None, :])[0])
    zx = jnp.pad(zx, ((0, Tp - T), (0, Bp - B), (0, 0))).astype(zx_dtype)   # (Tp, Bp, 4Hp)

    w_hh_p = jnp.pad(pad_gate_cols(w_hh_t),
                     ((0, Hp - H), (0, 0))).astype(matmul_dtype)            # (Hp, 4Hp)
    w_post_vec = jnp.pad(params["w_post"].astype(f32)[0], (0, Hp - H))      # (Hp,)
    b_post = params["b_post"].astype(f32)[0]

    kernel = functools.partial(_lstm_recurrence_kernel, tt=TT, hp=Hp, fuse_post=fuse_post)

    in_specs = [
        pl.BlockSpec((TT, BB, 4 * Hp), lambda b, t: (t, b, 0)),  # time-tiled, pipelined z_x
        pl.BlockSpec(memory_space=pl.ANY),                       # W_hh stays in HBM; manual DMA
    ]
    operands = [zx, w_hh_p]
    if fuse_post:
        in_specs.append(pl.BlockSpec((1, Hp), lambda b, t: (0, 0)))
        operands.append(w_post_vec[None, :])
        out_shape = jax.ShapeDtypeStruct((Tp, Bp), f32)
        out_specs = pl.BlockSpec((TT, BB), lambda b, t: (t, b))
    else:
        out_shape = jax.ShapeDtypeStruct((Tp, Bp, Hp), f32)
        out_specs = pl.BlockSpec((TT, BB, Hp), lambda b, t: (t, b, 0))

    out = pl.pallas_call(
        kernel,
        out_shape=out_shape,
        grid_spec=pltpu.PrefetchScalarGridSpec(
            num_scalar_prefetch=0,
            grid=(n_b_blocks, n_t_blocks),
            in_specs=in_specs,
            out_specs=out_specs,
            scratch_shapes=[
                pltpu.VMEM((Hp, 4 * Hp), matmul_dtype),   # resident W_hh (single buffer)
                pltpu.VMEM((BB, Hp), f32),                # h carry across time tiles
                pltpu.VMEM((BB, Hp), f32),                # c carry across time tiles
                pltpu.SemaphoreType.DMA,                  # W_hh copy completion
            ],
        ),
        compiler_params=pltpu.CompilerParams(
            # batch blocks independent -> parallel (v7x megacore); time steps sequential.
            dimension_semantics=("parallel", "arbitrary"),
            vmem_limit_bytes=budget,
        ),
    )(*operands)

    if fuse_post:
        y = out[:T, :B] + b_post                                             # (T, B)
    else:
        # post Linear (H -> 1) + squeeze(dim=-1) on the lane-dense hidden-state block.
        y = jnp.einsum("tbh,h->tb", out[:T, :B], w_post_vec) + b_post
    return y.T                                                               # (B, T)


def ref_forward(x, p):
    """Pure-JAX reference of LSTMEstimator.forward (PyTorch semantics)."""
    B, T, _ = x.shape
    H = p["w_hh"].shape[1]
    pre = jnp.einsum("btn,fn->btf", x, p["w_pre"]) + p["b_pre"]

    def step(carry, x_t):
        h, c = carry
        z = x_t @ p["w_ih"].T + p["b_ih"] + h @ p["w_hh"].T + p["b_hh"]
        i, f, g, o = jnp.split(z, 4, axis=-1)
        i, f, o = jax.nn.sigmoid(i), jax.nn.sigmoid(f), jax.nn.sigmoid(o)
        g = jnp.tanh(g)
        c = f * c + i * g
        h = o * jnp.tanh(c)
        return (h, c), h

    init = (jnp.zeros((B, H), jnp.float32), jnp.zeros((B, H), jnp.float32))
    _, hs = jax.lax.scan(step, init, jnp.swapaxes(pre, 0, 1))
    hs = jnp.swapaxes(hs, 0, 1)                                   # (B, T, H)
    out = hs @ p["w_post"].T + p["b_post"]                        # (B, T, 1)
    return out[..., 0]                                            # squeeze(dim=-1)


def init_params(key, input_dim, feature_dim, hidden_dim, output_dim=1):
    """Deterministic synthetic parameters with PyTorch shape conventions."""
    ks = jax.random.split(key, 8)
    s = 0.1
    return {
        # pre_module: Linear(input_dim, feature_dim)
        "w_pre": s * jax.random.normal(ks[0], (feature_dim, input_dim), jnp.float32),
        "b_pre": s * jax.random.normal(ks[1], (feature_dim,), jnp.float32),
        # nn.LSTM layer 0: weight_ih_l0 (4H, F), weight_hh_l0 (4H, H), biases (4H,)
        "w_ih": s * jax.random.normal(ks[2], (4 * hidden_dim, feature_dim), jnp.float32),
        "w_hh": s * jax.random.normal(ks[3], (4 * hidden_dim, hidden_dim), jnp.float32),
        "b_ih": s * jax.random.normal(ks[4], (4 * hidden_dim,), jnp.float32),
        "b_hh": s * jax.random.normal(ks[5], (4 * hidden_dim,), jnp.float32),
        # post_module: Linear(hidden_dim, output_dim)
        "w_post": s * jax.random.normal(ks[6], (output_dim, hidden_dim), jnp.float32),
        "b_post": s * jax.random.normal(ks[7], (output_dim,), jnp.float32),
    }


if __name__ == "__main__":
    input_dim, feature_dim, hidden_dim, output_dim = 16, 32, 32, 1

    key = jax.random.PRNGKey(0)
    k_x1, k_x2, k_p = jax.random.split(key, 3)
    params = init_params(k_p, input_dim, feature_dim, hidden_dim, output_dim)

    # Case 1: tiny batch (non-fused post path), bit-conservative f32 config, strict check.
    B1, T1 = 2, 8
    x1 = jax.random.normal(k_x1, (B1, T1, input_dim), jnp.float32)
    fwd_f32 = jax.jit(functools.partial(
        lstm_estimator_forward, matmul_dtype=jnp.float32, zx_dtype=jnp.float32))
    out1 = jax.block_until_ready(fwd_f32(x1, params))
    ref1 = jax.block_until_ready(ref_forward(x1, params))
    assert out1.shape == (B1, T1), out1.shape
    assert jnp.allclose(out1, ref1, atol=1e-4, rtol=1e-4)

    # Case 1b: same shape with the default bf16 recurrent matmul / bf16 z_x stream.
    out1b = jax.block_until_ready(jax.jit(lstm_estimator_forward)(x1, params))
    assert jnp.allclose(out1b, ref1, atol=2e-2, rtol=2e-2)

    # Case 2: batch large enough for the fused post-projection path (lane-dense (TT, BB)
    # output, 2 x 128 batch blocks -> both v7x TensorCores get work), default bf16 config.
    B2, T2 = 136, 8
    x2 = jax.random.normal(k_x2, (B2, T2, input_dim), jnp.float32)
    out2 = jax.block_until_ready(jax.jit(lstm_estimator_forward)(x2, params))
    ref2 = jax.block_until_ready(ref_forward(x2, params))
    assert out2.shape == (B2, T2), out2.shape
    assert jnp.allclose(out2, ref2, atol=2e-2, rtol=2e-2)

    print("KERNEL_OK")
</pallas_src>

<mosaic_0001>
module attributes {stable_mosaic.version = 11 : i64} {
  func.func @_lstm_recurrence_kernel(%arg0: i32, %arg1: i32, %arg2: memref<8x8x512xf32, #tpu.memory_space<vmem>>, %arg3: memref<128x512xf32, #tpu.memory_space<any>>, %arg4: memref<8x8x128xf32, #tpu.memory_space<vmem>>, %arg5: memref<128x512xf32, #tpu.memory_space<vmem>>, %arg6: memref<8x128xf32, #tpu.memory_space<vmem>>, %arg7: memref<8x128xf32, #tpu.memory_space<vmem>>, %arg8: memref<!tpu.dma_semaphore, #tpu.memory_space<semaphore_mem>>) attributes {dimension_semantics = [#tpu.dimension_semantics<parallel>, #tpu.dimension_semantics<arbitrary>], iteration_bounds = array<i64: 1, 1>, scalar_prefetch = 0 : i64, scratch_operands = 4 : i64, tpu.core_type = #tpu.core_type<tc>, window_params = [{transform_indices = @transform_0, window_bounds = array<i64: 8, 8, 512>}, {}, {transform_indices = @transform_2, window_bounds = array<i64: 8, 8, 128>}]} {
    %c0_i32 = arith.constant 0 : i32
    %0 = arith.cmpi eq, %arg1, %c0_i32 : i32
    %1 = arith.extui %0 : i1 to i32
    %c0_i32_0 = arith.constant 0 : i32
    %2 = arith.cmpi ne, %1, %c0_i32_0 : i32
    scf.if %2 {
      tpu.enqueue_dma source(%arg3 : memref<128x512xf32, #tpu.memory_space<any>>) target(%arg5 : memref<128x512xf32, #tpu.memory_space<vmem>>) target_semaphore(%arg8 : memref<!tpu.dma_semaphore, #tpu.memory_space<semaphore_mem>>)
      tpu.wait_dma2 semaphore(%arg8 : memref<!tpu.dma_semaphore, #tpu.memory_space<semaphore_mem>>) src(%arg3 : memref<128x512xf32, #tpu.memory_space<any>>) dst(%arg5 : memref<128x512xf32, #tpu.memory_space<vmem>>)
      %cst_122 = arith.constant 0.000000e+00 : f32
      %328 = vector.broadcast %cst_122 : f32 to vector<8x128xf32>
      %c0_123 = arith.constant 0 : index
      %c0_124 = arith.constant 0 : index
      %329 = vector.load %arg6[%c0_123, %c0_124] : memref<8x128xf32, #tpu.memory_space<vmem>>, vector<8x128xf32>
      tpu.vector_store %arg6[%c0_123, %c0_124], %328 {strides = array<i32>} : memref<8x128xf32, #tpu.memory_space<vmem>>, vector<8x128xf32>,
      %cst_125 = arith.constant 0.000000e+00 : f32
      %330 = vector.broadcast %cst_125 : f32 to vector<8x128xf32>
      %c0_126 = arith.constant 0 : index
      %c0_127 = arith.constant 0 : index
      %331 = vector.load %arg7[%c0_126, %c0_127] : memref<8x128xf32, #tpu.memory_space<vmem>>, vector<8x128xf32>
      tpu.vector_store %arg7[%c0_126, %c0_127], %330 {strides = array<i32>} : memref<8x128xf32, #tpu.memory_space<vmem>>, vector<8x128xf32>,
    } else {
    }
    %c0 = arith.constant 0 : index
    %c0_1 = arith.constant 0 : index
    %3 = vector.load %arg5[%c0, %c0_1] : memref<128x512xf32, #tpu.memory_space<vmem>>, vector<128x512xf32>
    %c0_2 = arith.constant 0 : index
    %c0_3 = arith.constant 0 : index
    %4 = vector.load %arg6[%c0_2, %c0_3] : memref<8x128xf32, #tpu.memory_space<vmem>>, vector<8x128xf32>
    %c0_4 = arith.constant 0 : index
    %c0_5 = arith.constant 0 : index
    %5 = vector.load %arg7[%c0_4, %c0_5] : memref<8x128xf32, #tpu.memory_space<vmem>>, vector<8x128xf32>
    %c0_i32_6 = arith.constant 0 : i32
    %6 = arith.index_cast %c0_i32_6 : i32 to index
    %c0_7 = arith.constant 0 : index
    %c0_8 = arith.constant 0 : index
    %7 = vector.load %arg2[%6, %c0_7, %c0_8] : memref<8x8x512xf32, #tpu.memory_space<vmem>>, vector<1x8x512xf32>
    %8 = vector.shape_cast %7 : vector<1x8x512xf32> to vector<8x512xf32>
    %cst = arith.constant dense<0.000000e+00> : vector<8x512xf32>
    %9 = tpu.matmul %4, %3, %cst {dimension_numbers = #tpu.dot_dimension_numbers<[1], [0], [0], [1], [0, 0, 1, 1], [], []>} : vector<8x128xf32>, vector<128x512xf32>, vector<8x512xf32> -> vector<8x512xf32>
    %10 = arith.addf %8, %9 : vector<8x512xf32>
    %11 = vector.extract_strided_slice %10 {offsets = [0, 0], sizes = [8, 128], strides = [1, 1]} : vector<8x512xf32> to vector<8x128xf32>
    %cst_9 = arith.constant 5.000000e-01 : f32
    %12 = vector.broadcast %cst_9 : f32 to vector<8x128xf32>
    %13 = arith.mulf %12, %11 : vector<8x128xf32>
    %14 = math.tanh %13 : vector<8x128xf32>
    %cst_10 = arith.constant 5.000000e-01 : f32
    %15 = vector.broadcast %cst_10 : f32 to vector<8x128xf32>
    %16 = arith.mulf %15, %14 : vector<8x128xf32>
    %cst_11 = arith.constant 5.000000e-01 : f32
    %17 = vector.broadcast %cst_11 : f32 to vector<8x128xf32>
    %18 = arith.addf %16, %17 : vector<8x128xf32>
    %19 = vector.extract_strided_slice %10 {offsets = [0, 128], sizes = [8, 128], strides = [1, 1]} : vector<8x512xf32> to vector<8x128xf32>
    %cst_12 = arith.constant 5.000000e-01 : f32
    %20 = vector.broadcast %cst_12 : f32 to vector<8x128xf32>
    %21 = arith.mulf %20, %19 : vector<8x128xf32>
    %22 = math.tanh %21 : vector<8x128xf32>
    %cst_13 = arith.constant 5.000000e-01 : f32
    %23 = vector.broadcast %cst_13 : f32 to vector<8x128xf32>
    %24 = arith.mulf %23, %22 : vector<8x128xf32>
    %cst_14 = arith.constant 5.000000e-01 : f32
    %25 = vector.broadcast %cst_14 : f32 to vector<8x128xf32>
    %26 = arith.addf %24, %25 : vector<8x128xf32>
    %27 = vector.extract_strided_slice %10 {offsets = [0, 256], sizes = [8, 128], strides = [1, 1]} : vector<8x512xf32> to vector<8x128xf32>
    %28 = math.tanh %27 : vector<8x128xf32>
    %29 = vector.extract_strided_slice %10 {offsets = [0, 384], sizes = [8, 128], strides = [1, 1]} : vector<8x512xf32> to vector<8x128xf32>
    %cst_15 = arith.constant 5.000000e-01 : f32
    %30 = vector.broadcast %cst_15 : f32 to vector<8x128xf32>
    %31 = arith.mulf %30, %29 : vector<8x128xf32>
    %32 = math.tanh %31 : vector<8x128xf32>
    %cst_16 = arith.constant 5.000000e-01 : f32
    %33 = vector.broadcast %cst_16 : f32 to vector<8x128xf32>
    %34 = arith.mulf %33, %32 : vector<8x128xf32>
    %cst_17 = arith.constant 5.000000e-01 : f32
    %35 = vector.broadcast %cst_17 : f32 to vector<8x128xf32>
    %36 = arith.addf %34, %35 : vector<8x128xf32>
    %37 = arith.mulf %26, %5 : vector<8x128xf32>
    %38 = arith.mulf %18, %28 : vector<8x128xf32>
    %39 = arith.addf %37, %38 : vector<8x128xf32>
    %40 = math.tanh %39 : vector<8x128xf32>
    %41 = arith.mulf %36, %40 : vector<8x128xf32>
    %42 = arith.index_cast %c0_i32_6 : i32 to index
    %c0_18 = arith.constant 0 : index
    %c0_19 = arith.constant 0 : index
    %43 = vector.load %arg4[%42, %c0_18, %c0_19] : memref<8x8x128xf32, #tpu.memory_space<vmem>>, vector<1x8x128xf32>
    %44 = vector.shape_cast %43 : vector<1x8x128xf32> to vector<8x128xf32>
    %45 = vector.shape_cast %41 : vector<8x128xf32> to vector<1x8x128xf32>
    tpu.vector_store %arg4[%42, %c0_18, %c0_19], %45 {strides = array<i32>} : memref<8x8x128xf32, #tpu.memory_space<vmem>>, vector<1x8x128xf32>,
    %c1_i32 = arith.constant 1 : i32
    %46 = arith.index_cast %c1_i32 : i32 to index
    %c0_20 = arith.constant 0 : index
    %c0_21 = arith.constant 0 : index
    %47 = vector.load %arg2[%46, %c0_20, %c0_21] : memref<8x8x512xf32, #tpu.memory_space<vmem>>, vector<1x8x512xf32>
    %48 = vector.shape_cast %47 : vector<1x8x512xf32> to vector<8x512xf32>
    %cst_22 = arith.constant dense<0.000000e+00> : vector<8x512xf32>
    %49 = tpu.matmul %41, %3, %cst_22 {dimension_numbers = #tpu.dot_dimension_numbers<[1], [0], [0], [1], [0, 0, 1, 1], [], []>} : vector<8x128xf32>, vector<128x512xf32>, vector<8x512xf32> -> vector<8x512xf32>
    %50 = arith.addf %48, %49 : vector<8x512xf32>
    %51 = vector.extract_strided_slice %50 {offsets = [0, 0], sizes = [8, 128], strides = [1, 1]} : vector<8x512xf32> to vector<8x128xf32>
    %cst_23 = arith.constant 5.000000e-01 : f32
    %52 = vector.broadcast %cst_23 : f32 to vector<8x128xf32>
    %53 = arith.mulf %52, %51 : vector<8x128xf32>
    %54 = math.tanh %53 : vector<8x128xf32>
    %cst_24 = arith.constant 5.000000e-01 : f32
    %55 = vector.broadcast %cst_24 : f32 to vector<8x128xf32>
    %56 = arith.mulf %55, %54 : vector<8x128xf32>
    %cst_25 = arith.constant 5.000000e-01 : f32
    %57 = vector.broadcast %cst_25 : f32 to vector<8x128xf32>
    %58 = arith.addf %56, %57 : vector<8x128xf32>
    %59 = vector.extract_strided_slice %50 {offsets = [0, 128], sizes = [8, 128], strides = [1, 1]} : vector<8x512xf32> to vector<8x128xf32>
    %cst_26 = arith.constant 5.000000e-01 : f32
    %60 = vector.broadcast %cst_26 : f32 to vector<8x128xf32>
    %61 = arith.mulf %60, %59 : vector<8x128xf32>
    %62 = math.tanh %61 : vector<8x128xf32>
    %cst_27 = arith.constant 5.000000e-01 : f32
    %63 = vector.broadcast %cst_27 : f32 to vector<8x128xf32>
    %64 = arith.mulf %63, %62 : vector<8x128xf32>
    %cst_28 = arith.constant 5.000000e-01 : f32
    %65 = vector.broadcast %cst_28 : f32 to vector<8x128xf32>
    %66 = arith.addf %64, %65 : vector<8x128xf32>
    %67 = vector.extract_strided_slice %50 {offsets = [0, 256], sizes = [8, 128], strides = [1, 1]} : vector<8x512xf32> to vector<8x128xf32>
    %68 = math.tanh %67 : vector<8x128xf32>
    %69 = vector.extract_strided_slice %50 {offsets = [0, 384], sizes = [8, 128], strides = [1, 1]} : vector<8x512xf32> to vector<8x128xf32>
    %cst_29 = arith.constant 5.000000e-01 : f32
    %70 = vector.broadcast %cst_29 : f32 to vector<8x128xf32>
    %71 = arith.mulf %70, %69 : vector<8x128xf32>
    %72 = math.tanh %71 : vector<8x128xf32>
    %cst_30 = arith.constant 5.000000e-01 : f32
    %73 = vector.broadcast %cst_30 : f32 to vector<8x128xf32>
    %74 = arith.mulf %73, %72 : vector<8x128xf32>
    %cst_31 = arith.constant 5.000000e-01 : f32
    %75 = vector.broadcast %cst_31 : f32 to vector<8x128xf32>
    %76 = arith.addf %74, %75 : vector<8x128xf32>
    %77 = arith.mulf %66, %39 : vector<8x128xf32>
    %78 = arith.mulf %58, %68 : vector<8x128xf32>
    %79 = arith.addf %77, %78 : vector<8x128xf32>
    %80 = math.tanh %79 : vector<8x128xf32>
    %81 = arith.mulf %76, %80 : vector<8x128xf32>
    %82 = arith.index_cast %c1_i32 : i32 to index
    %c0_32 = arith.constant 0 : index
    %c0_33 = arith.constant 0 : index
    %83 = vector.load %arg4[%82, %c0_32, %c0_33] : memref<8x8x128xf32, #tpu.memory_space<vmem>>, vector<1x8x128xf32>
    %84 = vector.shape_cast %83 : vector<1x8x128xf32> to vector<8x128xf32>
    %85 = vector.shape_cast %81 : vector<8x128xf32> to vector<1x8x128xf32>
    tpu.vector_store %arg4[%82, %c0_32, %c0_33], %85 {strides = array<i32>} : memref<8x8x128xf32, #tpu.memory_space<vmem>>, vector<1x8x128xf32>,
    %c2_i32 = arith.constant 2 : i32
    %86 = arith.index_cast %c2_i32 : i32 to index
    %c0_34 = arith.constant 0 : index
    %c0_35 = arith.constant 0 : index
    %87 = vector.load %arg2[%86, %c0_34, %c0_35] : memref<8x8x512xf32, #tpu.memory_space<vmem>>, vector<1x8x512xf32>
    %88 = vector.shape_cast %87 : vector<1x8x512xf32> to vector<8x512xf32>
    %cst_36 = arith.constant dense<0.000000e+00> : vector<8x512xf32>
    %89 = tpu.matmul %81, %3, %cst_36 {dimension_numbers = #tpu.dot_dimension_numbers<[1], [0], [0], [1], [0, 0, 1, 1], [], []>} : vector<8x128xf32>, vector<128x512xf32>, vector<8x512xf32> -> vector<8x512xf32>
    %90 = arith.addf %88, %89 : vector<8x512xf32>
    %91 = vector.extract_strided_slice %90 {offsets = [0, 0], sizes = [8, 128], strides = [1, 1]} : vector<8x512xf32> to vector<8x128xf32>
    %cst_37 = arith.constant 5.000000e-01 : f32
    %92 = vector.broadcast %cst_37 : f32 to vector<8x128xf32>
    %93 = arith.mulf %92, %91 : vector<8x128xf32>
    %94 = math.tanh %93 : vector<8x128xf32>
    %cst_38 = arith.constant 5.000000e-01 : f32
    %95 = vector.broadcast %cst_38 : f32 to vector<8x128xf32>
    %96 = arith.mulf %95, %94 : vector<8x128xf32>
    %cst_39 = arith.constant 5.000000e-01 : f32
    %97 = vector.broadcast %cst_39 : f32 to vector<8x128xf32>
    %98 = arith.addf %96, %97 : vector<8x128xf32>
    %99 = vector.extract_strided_slice %90 {offsets = [0, 128], sizes = [8, 128], strides = [1, 1]} : vector<8x512xf32> to vector<8x128xf32>
    %cst_40 = arith.constant 5.000000e-01 : f32
    %100 = vector.broadcast %cst_40 : f32 to vector<8x128xf32>
    %101 = arith.mulf %100, %99 : vector<8x128xf32>
    %102 = math.tanh %101 : vector<8x128xf32>
    %cst_41 = arith.constant 5.000000e-01 : f32
    %103 = vector.broadcast %cst_41 : f32 to vector<8x128xf32>
    %104 = arith.mulf %103, %102 : vector<8x128xf32>
    %cst_42 = arith.constant 5.000000e-01 : f32
    %105 = vector.broadcast %cst_42 : f32 to vector<8x128xf32>
    %106 = arith.addf %104, %105 : vector<8x128xf32>
    %107 = vector.extract_strided_slice %90 {offsets = [0, 256], sizes = [8, 128], strides = [1, 1]} : vector<8x512xf32> to vector<8x128xf32>
    %108 = math.tanh %107 : vector<8x128xf32>
    %109 = vector.extract_strided_slice %90 {offsets = [0, 384], sizes = [8, 128], strides = [1, 1]} : vector<8x512xf32> to vector<8x128xf32>
    %cst_43 = arith.constant 5.000000e-01 : f32
    %110 = vector.broadcast %cst_43 : f32 to vector<8x128xf32>
    %111 = arith.mulf %110, %109 : vector<8x128xf32>
    %112 = math.tanh %111 : vector<8x128xf32>
    %cst_44 = arith.constant 5.000000e-01 : f32
    %113 = vector.broadcast %cst_44 : f32 to vector<8x128xf32>
    %114 = arith.mulf %113, %112 : vector<8x128xf32>
    %cst_45 = arith.constant 5.000000e-01 : f32
    %115 = vector.broadcast %cst_45 : f32 to vector<8x128xf32>
    %116 = arith.addf %114, %115 : vector<8x128xf32>
    %117 = arith.mulf %106, %79 : vector<8x128xf32>
    %118 = arith.mulf %98, %108 : vector<8x128xf32>
    %119 = arith.addf %117, %118 : vector<8x128xf32>
    %120 = math.tanh %119 : vector<8x128xf32>
    %121 = arith.mulf %116, %120 : vector<8x128xf32>
    %122 = arith.index_cast %c2_i32 : i32 to index
    %c0_46 = arith.constant 0 : index
    %c0_47 = arith.constant 0 : index
    %123 = vector.load %arg4[%122, %c0_46, %c0_47] : memref<8x8x128xf32, #tpu.memory_space<vmem>>, vector<1x8x128xf32>
    %124 = vector.shape_cast %123 : vector<1x8x128xf32> to vector<8x128xf32>
    %125 = vector.shape_cast %121 : vector<8x128xf32> to vector<1x8x128xf32>
    tpu.vector_store %arg4[%122, %c0_46, %c0_47], %125 {strides = array<i32>} : memref<8x8x128xf32, #tpu.memory_space<vmem>>, vector<1x8x128xf32>,
    %c3_i32 = arith.constant 3 : i32
    %126 = arith.index_cast %c3_i32 : i32 to index
    %c0_48 = arith.constant 0 : index
    %c0_49 = arith.constant 0 : index
    %127 = vector.load %arg2[%126, %c0_48, %c0_49] : memref<8x8x512xf32, #tpu.memory_space<vmem>>, vector<1x8x512xf32>
    %128 = vector.shape_cast %127 : vector<1x8x512xf32> to vector<8x512xf32>
    %cst_50 = arith.constant dense<0.000000e+00> : vector<8x512xf32>
    %129 = tpu.matmul %121, %3, %cst_50 {dimension_numbers = #tpu.dot_dimension_numbers<[1], [0], [0], [1], [0, 0, 1, 1], [], []>} : vector<8x128xf32>, vector<128x512xf32>, vector<8x512xf32> -> vector<8x512xf32>
    %130 = arith.addf %128, %129 : vector<8x512xf32>
    %131 = vector.extract_strided_slice %130 {offsets = [0, 0], sizes = [8, 128], strides = [1, 1]} : vector<8x512xf32> to vector<8x128xf32>
    %cst_51 = arith.constant 5.000000e-01 : f32
    %132 = vector.broadcast %cst_51 : f32 to vector<8x128xf32>
    %133 = arith.mulf %132, %131 : vector<8x128xf32>
    %134 = math.tanh %133 : vector<8x128xf32>
    %cst_52 = arith.constant 5.000000e-01 : f32
    %135 = vector.broadcast %cst_52 : f32 to vector<8x128xf32>
    %136 = arith.mulf %135, %134 : vector<8x128xf32>
    %cst_53 = arith.constant 5.000000e-01 : f32
    %137 = vector.broadcast %cst_53 : f32 to vector<8x128xf32>
    %138 = arith.addf %136, %137 : vector<8x128xf32>
    %139 = vector.extract_strided_slice %130 {offsets = [0, 128], sizes = [8, 128], strides = [1, 1]} : vector<8x512xf32> to vector<8x128xf32>
    %cst_54 = arith.constant 5.000000e-01 : f32
    %140 = vector.broadcast %cst_54 : f32 to vector<8x128xf32>
    %141 = arith.mulf %140, %139 : vector<8x128xf32>
    %142 = math.tanh %141 : vector<8x128xf32>
    %cst_55 = arith.constant 5.000000e-01 : f32
    %143 = vector.broadcast %cst_55 : f32 to vector<8x128xf32>
    %144 = arith.mulf %143, %142 : vector<8x128xf32>
    %cst_56 = arith.constant 5.000000e-01 : f32
    %145 = vector.broadcast %cst_56 : f32 to vector<8x128xf32>
    %146 = arith.addf %144, %145 : vector<8x128xf32>
    %147 = vector.extract_strided_slice %130 {offsets = [0, 256], sizes = [8, 128], strides = [1, 1]} : vector<8x512xf32> to vector<8x128xf32>
    %148 = math.tanh %147 : vector<8x128xf32>
    %149 = vector.extract_strided_slice %130 {offsets = [0, 384], sizes = [8, 128], strides = [1, 1]} : vector<8x512xf32> to vector<8x128xf32>
    %cst_57 = arith.constant 5.000000e-01 : f32
    %150 = vector.broadcast %cst_57 : f32 to vector<8x128xf32>
    %151 = arith.mulf %150, %149 : vector<8x128xf32>
    %152 = math.tanh %151 : vector<8x128xf32>
    %cst_58 = arith.constant 5.000000e-01 : f32
    %153 = vector.broadcast %cst_58 : f32 to vector<8x128xf32>
    %154 = arith.mulf %153, %152 : vector<8x128xf32>
    %cst_59 = arith.constant 5.000000e-01 : f32
    %155 = vector.broadcast %cst_59 : f32 to vector<8x128xf32>
    %156 = arith.addf %154, %155 : vector<8x128xf32>
    %157 = arith.mulf %146, %119 : vector<8x128xf32>
    %158 = arith.mulf %138, %148 : vector<8x128xf32>
    %159 = arith.addf %157, %158 : vector<8x128xf32>
    %160 = math.tanh %159 : vector<8x128xf32>
    %161 = arith.mulf %156, %160 : vector<8x128xf32>
    %162 = arith.index_cast %c3_i32 : i32 to index
    %c0_60 = arith.constant 0 : index
    %c0_61 = arith.constant 0 : index
    %163 = vector.load %arg4[%162, %c0_60, %c0_61] : memref<8x8x128xf32, #tpu.memory_space<vmem>>, vector<1x8x128xf32>
    %164 = vector.shape_cast %163 : vector<1x8x128xf32> to vector<8x128xf32>
    %165 = vector.shape_cast %161 : vector<8x128xf32> to vector<1x8x128xf32>
    tpu.vector_store %arg4[%162, %c0_60, %c0_61], %165 {strides = array<i32>} : memref<8x8x128xf32, #tpu.memory_space<vmem>>, vector<1x8x128xf32>,
    %c4_i32 = arith.constant 4 : i32
    %166 = arith.index_cast %c4_i32 : i32 to index
    %c0_62 = arith.constant 0 : index
    %c0_63 = arith.constant 0 : index
    %167 = vector.load %arg2[%166, %c0_62, %c0_63] : memref<8x8x512xf32, #tpu.memory_space<vmem>>, vector<1x8x512xf32>
    %168 = vector.shape_cast %167 : vector<1x8x512xf32> to vector<8x512xf32>
    %cst_64 = arith.constant dense<0.000000e+00> : vector<8x512xf32>
    %169 = tpu.matmul %161, %3, %cst_64 {dimension_numbers = #tpu.dot_dimension_numbers<[1], [0], [0], [1], [0, 0, 1, 1], [], []>} : vector<8x128xf32>, vector<128x512xf32>, vector<8x512xf32> -> vector<8x512xf32>
    %170 = arith.addf %168, %169 : vector<8x512xf32>
    %171 = vector.extract_strided_slice %170 {offsets = [0, 0], sizes = [8, 128], strides = [1, 1]} : vector<8x512xf32> to vector<8x128xf32>
    %cst_65 = arith.constant 5.000000e-01 : f32
    %172 = vector.broadcast %cst_65 : f32 to vector<8x128xf32>
    %173 = arith.mulf %172, %171 : vector<8x128xf32>
    %174 = math.tanh %173 : vector<8x128xf32>
    %cst_66 = arith.constant 5.000000e-01 : f32
    %175 = vector.broadcast %cst_66 : f32 to vector<8x128xf32>
    %176 = arith.mulf %175, %174 : vector<8x128xf32>
    %cst_67 = arith.constant 5.000000e-01 : f32
    %177 = vector.broadcast %cst_67 : f32 to vector<8x128xf32>
    %178 = arith.addf %176, %177 : vector<8x128xf32>
    %179 = vector.extract_strided_slice %170 {offsets = [0, 128], sizes = [8, 128], strides = [1, 1]} : vector<8x512xf32> to vector<8x128xf32>
    %cst_68 = arith.constant 5.000000e-01 : f32
    %180 = vector.broadcast %cst_68 : f32 to vector<8x128xf32>
    %181 = arith.mulf %180, %179 : vector<8x128xf32>
    %182 = math.tanh %181 : vector<8x128xf32>
    %cst_69 = arith.constant 5.000000e-01 : f32
    %183 = vector.broadcast %cst_69 : f32 to vector<8x128xf32>
    %184 = arith.mulf %183, %182 : vector<8x128xf32>
    %cst_70 = arith.constant 5.000000e-01 : f32
    %185 = vector.broadcast %cst_70 : f32 to vector<8x128xf32>
    %186 = arith.addf %184, %185 : vector<8x128xf32>
    %187 = vector.extract_strided_slice %170 {offsets = [0, 256], sizes = [8, 128], strides = [1, 1]} : vector<8x512xf32> to vector<8x128xf32>
    %188 = math.tanh %187 : vector<8x128xf32>
    %189 = vector.extract_strided_slice %170 {offsets = [0, 384], sizes = [8, 128], strides = [1, 1]} : vector<8x512xf32> to vector<8x128xf32>
    %cst_71 = arith.constant 5.000000e-01 : f32
    %190 = vector.broadcast %cst_71 : f32 to vector<8x128xf32>
    %191 = arith.mulf %190, %189 : vector<8x128xf32>
    %192 = math.tanh %191 : vector<8x128xf32>
    %cst_72 = arith.constant 5.000000e-01 : f32
    %193 = vector.broadcast %cst_72 : f32 to vector<8x128xf32>
    %194 = arith.mulf %193, %192 : vector<8x128xf32>
    %cst_73 = arith.constant 5.000000e-01 : f32
    %195 = vector.broadcast %cst_73 : f32 to vector<8x128xf32>
    %196 = arith.addf %194, %195 : vector<8x128xf32>
    %197 = arith.mulf %186, %159 : vector<8x128xf32>
    %198 = arith.mulf %178, %188 : vector<8x128xf32>
    %199 = arith.addf %197, %198 : vector<8x128xf32>
    %200 = math.tanh %199 : vector<8x128xf32>
    %201 = arith.mulf %196, %200 : vector<8x128xf32>
    %202 = arith.index_cast %c4_i32 : i32 to index
    %c0_74 = arith.constant 0 : index
    %c0_75 = arith.constant 0 : index
    %203 = vector.load %arg4[%202, %c0_74, %c0_75] : memref<8x8x128xf32, #tpu.memory_space<vmem>>, vector<1x8x128xf32>
    %204 = vector.shape_cast %203 : vector<1x8x128xf32> to vector<8x128xf32>
    %205 = vector.shape_cast %201 : vector<8x128xf32> to vector<1x8x128xf32>
    tpu.vector_store %arg4[%202, %c0_74, %c0_75], %205 {strides = array<i32>} : memref<8x8x128xf32, #tpu.memory_space<vmem>>, vector<1x8x128xf32>,
    %c5_i32 = arith.constant 5 : i32
    %206 = arith.index_cast %c5_i32 : i32 to index
    %c0_76 = arith.constant 0 : index
    %c0_77 = arith.constant 0 : index
    %207 = vector.load %arg2[%206, %c0_76, %c0_77] : memref<8x8x512xf32, #tpu.memory_space<vmem>>, vector<1x8x512xf32>
    %208 = vector.shape_cast %207 : vector<1x8x512xf32> to vector<8x512xf32>
    %cst_78 = arith.constant dense<0.000000e+00> : vector<8x512xf32>
    %209 = tpu.matmul %201, %3, %cst_78 {dimension_numbers = #tpu.dot_dimension_numbers<[1], [0], [0], [1], [0, 0, 1, 1], [], []>} : vector<8x128xf32>, vector<128x512xf32>, vector<8x512xf32> -> vector<8x512xf32>
    %210 = arith.addf %208, %209 : vector<8x512xf32>
    %211 = vector.extract_strided_slice %210 {offsets = [0, 0], sizes = [8, 128], strides = [1, 1]} : vector<8x512xf32> to vector<8x128xf32>
    %cst_79 = arith.constant 5.000000e-01 : f32
    %212 = vector.broadcast %cst_79 : f32 to vector<8x128xf32>
    %213 = arith.mulf %212, %211 : vector<8x128xf32>
    %214 = math.tanh %213 : vector<8x128xf32>
    %cst_80 = arith.constant 5.000000e-01 : f32
    %215 = vector.broadcast %cst_80 : f32 to vector<8x128xf32>
    %216 = arith.mulf %215, %214 : vector<8x128xf32>
    %cst_81 = arith.constant 5.000000e-01 : f32
    %217 = vector.broadcast %cst_81 : f32 to vector<8x128xf32>
    %218 = arith.addf %216, %217 : vector<8x128xf32>
    %219 = vector.extract_strided_slice %210 {offsets = [0, 128], sizes = [8, 128], strides = [1, 1]} : vector<8x512xf32> to vector<8x128xf32>
    %cst_82 = arith.constant 5.000000e-01 : f32
    %220 = vector.broadcast %cst_82 : f32 to vector<8x128xf32>
    %221 = arith.mulf %220, %219 : vector<8x128xf32>
    %222 = math.tanh %221 : vector<8x128xf32>
    %cst_83 = arith.constant 5.000000e-01 : f32
    %223 = vector.broadcast %cst_83 : f32 to vector<8x128xf32>
    %224 = arith.mulf %223, %222 : vector<8x128xf32>
    %cst_84 = arith.constant 5.000000e-01 : f32
    %225 = vector.broadcast %cst_84 : f32 to vector<8x128xf32>
    %226 = arith.addf %224, %225 : vector<8x128xf32>
    %227 = vector.extract_strided_slice %210 {offsets = [0, 256], sizes = [8, 128], strides = [1, 1]} : vector<8x512xf32> to vector<8x128xf32>
    %228 = math.tanh %227 : vector<8x128xf32>
    %229 = vector.extract_strided_slice %210 {offsets = [0, 384], sizes = [8, 128], strides = [1, 1]} : vector<8x512xf32> to vector<8x128xf32>
    %cst_85 = arith.constant 5.000000e-01 : f32
    %230 = vector.broadcast %cst_85 : f32 to vector<8x128xf32>
    %231 = arith.mulf %230, %229 : vector<8x128xf32>
    %232 = math.tanh %231 : vector<8x128xf32>
    %cst_86 = arith.constant 5.000000e-01 : f32
    %233 = vector.broadcast %cst_86 : f32 to vector<8x128xf32>
    %234 = arith.mulf %233, %232 : vector<8x128xf32>
    %cst_87 = arith.constant 5.000000e-01 : f32
    %235 = vector.broadcast %cst_87 : f32 to vector<8x128xf32>
    %236 = arith.addf %234, %235 : vector<8x128xf32>
    %237 = arith.mulf %226, %199 : vector<8x128xf32>
    %238 = arith.mulf %218, %228 : vector<8x128xf32>
    %239 = arith.addf %237, %238 : vector<8x128xf32>
    %240 = math.tanh %239 : vector<8x128xf32>
    %241 = arith.mulf %236, %240 : vector<8x128xf32>
    %242 = arith.index_cast %c5_i32 : i32 to index
    %c0_88 = arith.constant 0 : index
    %c0_89 = arith.constant 0 : index
    %243 = vector.load %arg4[%242, %c0_88, %c0_89] : memref<8x8x128xf32, #tpu.memory_space<vmem>>, vector<1x8x128xf32>
    %244 = vector.shape_cast %243 : vector<1x8x128xf32> to vector<8x128xf32>
    %245 = vector.shape_cast %241 : vector<8x128xf32> to vector<1x8x128xf32>
    tpu.vector_store %arg4[%242, %c0_88, %c0_89], %245 {strides = array<i32>} : memref<8x8x128xf32, #tpu.memory_space<vmem>>, vector<1x8x128xf32>,
    %c6_i32 = arith.constant 6 : i32
    %246 = arith.index_cast %c6_i32 : i32 to index
    %c0_90 = arith.constant 0 : index
    %c0_91 = arith.constant 0 : index
    %247 = vector.load %arg2[%246, %c0_90, %c0_91] : memref<8x8x512xf32, #tpu.memory_space<vmem>>, vector<1x8x512xf32>
    %248 = vector.shape_cast %247 : vector<1x8x512xf32> to vector<8x512xf32>
    %cst_92 = arith.constant dense<0.000000e+00> : vector<8x512xf32>
    %249 = tpu.matmul %241, %3, %cst_92 {dimension_numbers = #tpu.dot_dimension_numbers<[1], [0], [0], [1], [0, 0, 1, 1], [], []>} : vector<8x128xf32>, vector<128x512xf32>, vector<8x512xf32> -> vector<8x512xf32>
    %250 = arith.addf %248, %249 : vector<8x512xf32>
    %251 = vector.extract_strided_slice %250 {offsets = [0, 0], sizes = [8, 128], strides = [1, 1]} : vector<8x512xf32> to vector<8x128xf32>
    %cst_93 = arith.constant 5.000000e-01 : f32
    %252 = vector.broadcast %cst_93 : f32 to vector<8x128xf32>
    %253 = arith.mulf %252, %251 : vector<8x128xf32>
    %254 = math.tanh %253 : vector<8x128xf32>
    %cst_94 = arith.constant 5.000000e-01 : f32
    %255 = vector.broadcast %cst_94 : f32 to vector<8x128xf32>
    %256 = arith.mulf %255, %254 : vector<8x128xf32>
    %cst_95 = arith.constant 5.000000e-01 : f32
    %257 = vector.broadcast %cst_95 : f32 to vector<8x128xf32>
    %258 = arith.addf %256, %257 : vector<8x128xf32>
    %259 = vector.extract_strided_slice %250 {offsets = [0, 128], sizes = [8, 128], strides = [1, 1]} : vector<8x512xf32> to vector<8x128xf32>
    %cst_96 = arith.constant 5.000000e-01 : f32
    %260 = vector.broadcast %cst_96 : f32 to vector<8x128xf32>
    %261 = arith.mulf %260, %259 : vector<8x128xf32>
    %262 = math.tanh %261 : vector<8x128xf32>
    %cst_97 = arith.constant 5.000000e-01 : f32
    %263 = vector.broadcast %cst_97 : f32 to vector<8x128xf32>
    %264 = arith.mulf %263, %262 : vector<8x128xf32>
    %cst_98 = arith.constant 5.000000e-01 : f32
    %265 = vector.broadcast %cst_98 : f32 to vector<8x128xf32>
    %266 = arith.addf %264, %265 : vector<8x128xf32>
    %267 = vector.extract_strided_slice %250 {offsets = [0, 256], sizes = [8, 128], strides = [1, 1]} : vector<8x512xf32> to vector<8x128xf32>
    %268 = math.tanh %267 : vector<8x128xf32>
    %269 = vector.extract_strided_slice %250 {offsets = [0, 384], sizes = [8, 128], strides = [1, 1]} : vector<8x512xf32> to vector<8x128xf32>
    %cst_99 = arith.constant 5.000000e-01 : f32
    %270 = vector.broadcast %cst_99 : f32 to vector<8x128xf32>
    %271 = arith.mulf %270, %269 : vector<8x128xf32>
    %272 = math.tanh %271 : vector<8x128xf32>
    %cst_100 = arith.constant 5.000000e-01 : f32
    %273 = vector.broadcast %cst_100 : f32 to vector<8x128xf32>
    %274 = arith.mulf %273, %272 : vector<8x128xf32>
    %cst_101 = arith.constant 5.000000e-01 : f32
    %275 = vector.broadcast %cst_101 : f32 to vector<8x128xf32>
    %276 = arith.addf %274, %275 : vector<8x128xf32>
    %277 = arith.mulf %266, %239 : vector<8x128xf32>
    %278 = arith.mulf %258, %268 : vector<8x128xf32>
    %279 = arith.addf %277, %278 : vector<8x128xf32>
    %280 = math.tanh %279 : vector<8x128xf32>
    %281 = arith.mulf %276, %280 : vector<8x128xf32>
    %282 = arith.index_cast %c6_i32 : i32 to index
    %c0_102 = arith.constant 0 : index
    %c0_103 = arith.constant 0 : index
    %283 = vector.load %arg4[%282, %c0_102, %c0_103] : memref<8x8x128xf32, #tpu.memory_space<vmem>>, vector<1x8x128xf32>
    %284 = vector.shape_cast %283 : vector<1x8x128xf32> to vector<8x128xf32>
    %285 = vector.shape_cast %281 : vector<8x128xf32> to vector<1x8x128xf32>
    tpu.vector_store %arg4[%282, %c0_102, %c0_103], %285 {strides = array<i32>} : memref<8x8x128xf32, #tpu.memory_space<vmem>>, vector<1x8x128xf32>,
    %c7_i32 = arith.constant 7 : i32
    %286 = arith.index_cast %c7_i32 : i32 to index
    %c0_104 = arith.constant 0 : index
    %c0_105 = arith.constant 0 : index
    %287 = vector.load %arg2[%286, %c0_104, %c0_105] : memref<8x8x512xf32, #tpu.memory_space<vmem>>, vector<1x8x512xf32>
    %288 = vector.shape_cast %287 : vector<1x8x512xf32> to vector<8x512xf32>
    %cst_106 = arith.constant dense<0.000000e+00> : vector<8x512xf32>
    %289 = tpu.matmul %281, %3, %cst_106 {dimension_numbers = #tpu.dot_dimension_numbers<[1], [0], [0], [1], [0, 0, 1, 1], [], []>} : vector<8x128xf32>, vector<128x512xf32>, vector<8x512xf32> -> vector<8x512xf32>
    %290 = arith.addf %288, %289 : vector<8x512xf32>
    %291 = vector.extract_strided_slice %290 {offsets = [0, 0], sizes = [8, 128], strides = [1, 1]} : vector<8x512xf32> to vector<8x128xf32>
    %cst_107 = arith.constant 5.000000e-01 : f32
    %292 = vector.broadcast %cst_107 : f32 to vector<8x128xf32>
    %293 = arith.mulf %292, %291 : vector<8x128xf32>
    %294 = math.tanh %293 : vector<8x128xf32>
    %cst_108 = arith.constant 5.000000e-01 : f32
    %295 = vector.broadcast %cst_108 : f32 to vector<8x128xf32>
    %296 = arith.mulf %295, %294 : vector<8x128xf32>
    %cst_109 = arith.constant 5.000000e-01 : f32
    %297 = vector.broadcast %cst_109 : f32 to vector<8x128xf32>
    %298 = arith.addf %296, %297 : vector<8x128xf32>
    %299 = vector.extract_strided_slice %290 {offsets = [0, 128], sizes = [8, 128], strides = [1, 1]} : vector<8x512xf32> to vector<8x128xf32>
    %cst_110 = arith.constant 5.000000e-01 : f32
    %300 = vector.broadcast %cst_110 : f32 to vector<8x128xf32>
    %301 = arith.mulf %300, %299 : vector<8x128xf32>
    %302 = math.tanh %301 : vector<8x128xf32>
    %cst_111 = arith.constant 5.000000e-01 : f32
    %303 = vector.broadcast %cst_111 : f32 to vector<8x128xf32>
    %304 = arith.mulf %303, %302 : vector<8x128xf32>
    %cst_112 = arith.constant 5.000000e-01 : f32
    %305 = vector.broadcast %cst_112 : f32 to vector<8x128xf32>
    %306 = arith.addf %304, %305 : vector<8x128xf32>
    %307 = vector.extract_strided_slice %290 {offsets = [0, 256], sizes = [8, 128], strides = [1, 1]} : vector<8x512xf32> to vector<8x128xf32>
    %308 = math.tanh %307 : vector<8x128xf32>
    %309 = vector.extract_strided_slice %290 {offsets = [0, 384], sizes = [8, 128], strides = [1, 1]} : vector<8x512xf32> to vector<8x128xf32>
    %cst_113 = arith.constant 5.000000e-01 : f32
    %310 = vector.broadcast %cst_113 : f32 to vector<8x128xf32>
    %311 = arith.mulf %310, %309 : vector<8x128xf32>
    %312 = math.tanh %311 : vector<8x128xf32>
    %cst_114 = arith.constant 5.000000e-01 : f32
    %313 = vector.broadcast %cst_114 : f32 to vector<8x128xf32>
    %314 = arith.mulf %313, %312 : vector<8x128xf32>
    %cst_115 = arith.constant 5.000000e-01 : f32
    %315 = vector.broadcast %cst_115 : f32 to vector<8x128xf32>
    %316 = arith.addf %314, %315 : vector<8x128xf32>
    %317 = arith.mulf %306, %279 : vector<8x128xf32>
    %318 = arith.mulf %298, %308 : vector<8x128xf32>
    %319 = arith.addf %317, %318 : vector<8x128xf32>
    %320 = math.tanh %319 : vector<8x128xf32>
    %321 = arith.mulf %316, %320 : vector<8x128xf32>
    %322 = arith.index_cast %c7_i32 : i32 to index
    %c0_116 = arith.constant 0 : index
    %c0_117 = arith.constant 0 : index
    %323 = vector.load %arg4[%322, %c0_116, %c0_117] : memref<8x8x128xf32, #tpu.memory_space<vmem>>, vector<1x8x128xf32>
    %324 = vector.shape_cast %323 : vector<1x8x128xf32> to vector<8x128xf32>
    %325 = vector.shape_cast %321 : vector<8x128xf32> to vector<1x8x128xf32>
    tpu.vector_store %arg4[%322, %c0_116, %c0_117], %325 {strides = array<i32>} : memref<8x8x128xf32, #tpu.memory_space<vmem>>, vector<1x8x128xf32>,
    %c8_i32 = arith.constant 8 : i32
    %c0_118 = arith.constant 0 : index
    %c0_119 = arith.constant 0 : index
    %326 = vector.load %arg6[%c0_118, %c0_119] : memref<8x128xf32, #tpu.memory_space<vmem>>, vector<8x128xf32>
    tpu.vector_store %arg6[%c0_118, %c0_119], %321 {strides = array<i32>} : memref<8x128xf32, #tpu.memory_space<vmem>>, vector<8x128xf32>,
    %c0_120 = arith.constant 0 : index
    %c0_121 = arith.constant 0 : index
    %327 = vector.load %arg7[%c0_120, %c0_121] : memref<8x128xf32, #tpu.memory_space<vmem>>, vector<8x128xf32>
    tpu.vector_store %arg7[%c0_120, %c0_121], %319 {strides = array<i32>} : memref<8x128xf32, #tpu.memory_space<vmem>>, vector<8x128xf32>,
    return
  }
  func.func @transform_0(%arg0: i32, %arg1: i32) -> (i32, i32, i32) {
    %c0_i32 = arith.constant 0 : i32
    %c0_i32_0 = arith.constant 0 : i32
    return %arg1, %arg0, %c0_i32 : i32, i32, i32
  }
  func.func @transform_2(%arg0: i32, %arg1: i32) -> (i32, i32, i32) {
    %c0_i32 = arith.constant 0 : i32
    %c0_i32_0 = arith.constant 0 : i32
    return %arg1, %arg0, %c0_i32 : i32, i32, i32
  }
}

</mosaic_0001>

<bundles_post_ra>
// kernel: lstm_estimator_forward.1
= control target key start
LH: loop header
LB: loop body
LE: loop exit
PB: predicated region body
PF: predicated region fallthrough
CT: control target
= control target key end

     0   :  { %s2769_s0 = inlined_call_operand.vmem [shape: f32[8,8,512], index: 0, kind: input, shape index: {}]   ;;  %s2770_s1 = inlined_call_operand.vmem [shape: f32[128,512], index: 1, kind: input, shape index: {}]   ;;  %s2771_s2 = inlined_call_operand.vmem [shape: f32[8,8,128], index: 2, kind: output, shape index: {}]  }
   0x1   :  { %v1778_v0 = vld [vmem:[%s2770_s1] sm:$0xff]  ;;  %v1783_v1 = vld [vmem:[%s2770_s1 + $0x8] sm:$0xff]  ;;  %v1788_v2 = vld [vmem:[%s2770_s1 + $0x10] sm:$0xff] }
   0x2   :  { %2818 = vst [vmem:[#allocation8_spill] sm:$0xff] %v1778_v0  ;;  %2819 = vst [vmem:[#allocation9_spill] sm:$0xff] %v1783_v1  ;;  %v1793_v3 = vld [vmem:[%s2770_s1 + $0x18] sm:$0xff]  ;;  %v1798_v4 = vld [vmem:[%s2770_s1 + $0x20] sm:$0xff] }
   0x3   :  { %2820 = vst [vmem:[#allocation10_spill] sm:$0xff] %v1788_v2  ;;  %2821 = vst [vmem:[#allocation11_spill] sm:$0xff] %v1793_v3  ;;  %v1803_v5 = vld [vmem:[%s2770_s1 + $0x28] sm:$0xff]  ;;  %v1808_v6 = vld [vmem:[%s2770_s1 + $0x30] sm:$0xff] }
   0x4   :  { %2822 = vst [vmem:[#allocation12_spill] sm:$0xff] %v1798_v4  ;;  %2823 = vst [vmem:[#allocation13_spill] sm:$0xff] %v1803_v5  ;;  %v1813_v7 = vld [vmem:[%s2770_s1 + $0x38] sm:$0xff]  ;;  %v1818_v8 = vld [vmem:[%s2770_s1 + $0x40] sm:$0xff] }
   0x5   :  { %2824 = vst [vmem:[#allocation14_spill] sm:$0xff] %v1808_v6  ;;  %2825 = vst [vmem:[#allocation15_spill] sm:$0xff] %v1813_v7  ;;  %v1823_v9 = vld [vmem:[%s2770_s1 + $0x48] sm:$0xff]  ;;  %v1828_v10 = vld [vmem:[%s2770_s1 + $0x50] sm:$0xff] }
   0x6   :  { %2826 = vst [vmem:[#allocation16_spill] sm:$0xff] %v1818_v8  ;;  %2827 = vst [vmem:[#allocation17_spill] sm:$0xff] %v1823_v9  ;;  %v1833_v11 = vld [vmem:[%s2770_s1 + $0x58] sm:$0xff]  ;;  %v1838_v12 = vld [vmem:[%s2770_s1 + $0x60] sm:$0xff] }
   0x7   :  { %2828 = vst [vmem:[#allocation18_spill] sm:$0xff] %v1828_v10  ;;  %2829 = vst [vmem:[#allocation19_spill] sm:$0xff] %v1833_v11  ;;  %v1843_v13 = vld [vmem:[%s2770_s1 + $0x68] sm:$0xff]  ;;  %v1848_v14 = vld [vmem:[%s2770_s1 + $0x70] sm:$0xff] }
   0x8   :  { %2830 = vst [vmem:[#allocation20_spill] sm:$0xff] %v1838_v12  ;;  %2831 = vst [vmem:[#allocation21_spill] sm:$0xff] %v1843_v13  ;;  %v1853_v15 = vld [vmem:[%s2770_s1 + $0x78] sm:$0xff]  ;;  %v1858_v16 = vld [vmem:[%s2770_s1 + $0x80] sm:$0xff] }
   0x9   :  { %2832 = vst [vmem:[#allocation22_spill] sm:$0xff] %v1848_v14  ;;  %2833 = vst [vmem:[#allocation23_spill] sm:$0xff] %v1853_v15  ;;  %v1863_v17 = vld [vmem:[%s2770_s1 + $0x88] sm:$0xff]  ;;  %v1868_v18 = vld [vmem:[%s2770_s1 + $0x90] sm:$0xff] }
   0xa   :  { %v1873_v19 = vld [vmem:[%s2770_s1 + $0x98] sm:$0xff]  ;;  %v1878_v20 = vld [vmem:[%s2770_s1 + $0xa0] sm:$0xff]  ;;  %v1883_v21 = vld [vmem:[%s2770_s1 + $0xa8] sm:$0xff] }
   0xb   :  { %2834 = vst [vmem:[#allocation24_spill] sm:$0xff] %v1883_v21  ;;  %v1888_v22 = vld [vmem:[%s2770_s1 + $0xb0] sm:$0xff]  ;;  %v1893_v23 = vld [vmem:[%s2770_s1 + $0xb8] sm:$0xff]  ;;  %v1898_v24 = vld [vmem:[%s2770_s1 + $0xc0] sm:$0xff] }
   0xc   :  { %v1903_v25 = vld [vmem:[%s2770_s1 + $0xc8] sm:$0xff]  ;;  %v1908_v26 = vld [vmem:[%s2770_s1 + $0xd0] sm:$0xff]  ;;  %v1913_v27 = vld [vmem:[%s2770_s1 + $0xd8] sm:$0xff] }
   0xd   :  { %v1918_v28 = vld [vmem:[%s2770_s1 + $0xe0] sm:$0xff]  ;;  %v1923_v29 = vld [vmem:[%s2770_s1 + $0xe8] sm:$0xff]  ;;  %v1928_v30 = vld [vmem:[%s2770_s1 + $0xf0] sm:$0xff] }
   0xe   :  { %v1933_v31 = vld [vmem:[%s2770_s1 + $0xf8] sm:$0xff]  ;;  %v1938_v32 = vld [vmem:[%s2770_s1 + $0x100] sm:$0xff]  ;;  %v1943_v33 = vld [vmem:[%s2770_s1 + $0x108] sm:$0xff] }
   0xf   :  { %v1948_v34 = vld [vmem:[%s2770_s1 + $0x110] sm:$0xff]  ;;  %v1953_v35 = vld [vmem:[%s2770_s1 + $0x118] sm:$0xff]  ;;  %v1958_v36 = vld [vmem:[%s2770_s1 + $0x120] sm:$0xff] }
  0x10   :  { %v1963_v37 = vld [vmem:[%s2770_s1 + $0x128] sm:$0xff]  ;;  %v1968_v38 = vld [vmem:[%s2770_s1 + $0x130] sm:$0xff]  ;;  %v1973_v39 = vld [vmem:[%s2770_s1 + $0x138] sm:$0xff] }
  0x11   :  { %v1978_v40 = vld [vmem:[%s2770_s1 + $0x140] sm:$0xff]  ;;  %v1983_v41 = vld [vmem:[%s2770_s1 + $0x148] sm:$0xff]  ;;  %v1988_v42 = vld [vmem:[%s2770_s1 + $0x150] sm:$0xff] }
  0x12   :  { %v1993_v43 = vld [vmem:[%s2770_s1 + $0x158] sm:$0xff]  ;;  %v1998_v44 = vld [vmem:[%s2770_s1 + $0x160] sm:$0xff]  ;;  %v2003_v45 = vld [vmem:[%s2770_s1 + $0x168] sm:$0xff] }
  0x13   :  { %v2008_v46 = vld [vmem:[%s2770_s1 + $0x170] sm:$0xff]  ;;  %v2013_v47 = vld [vmem:[%s2770_s1 + $0x178] sm:$0xff]  ;;  %v2018_v48 = vld [vmem:[%s2770_s1 + $0x180] sm:$0xff] }
  0x14   :  { %v2023_v49 = vld [vmem:[%s2770_s1 + $0x188] sm:$0xff]  ;;  %v2028_v50 = vld [vmem:[%s2770_s1 + $0x190] sm:$0xff]  ;;  %v2033_v51 = vld [vmem:[%s2770_s1 + $0x198] sm:$0xff] }
  0x15   :  { %v2038_v52 = vld [vmem:[%s2770_s1 + $0x1a0] sm:$0xff]  ;;  %v2043_v53 = vld [vmem:[%s2770_s1 + $0x1a8] sm:$0xff]  ;;  %v2048_v54 = vld [vmem:[%s2770_s1 + $0x1b0] sm:$0xff] }
  0x16   :  { %v2053_v55 = vld [vmem:[%s2770_s1 + $0x1b8] sm:$0xff]  ;;  %v2058_v56 = vld [vmem:[%s2770_s1 + $0x1c0] sm:$0xff]  ;;  %v2063_v57 = vld [vmem:[%s2770_s1 + $0x1c8] sm:$0xff] }
  0x17   :  { %v2068_v58 = vld [vmem:[%s2770_s1 + $0x1d0] sm:$0xff]  ;;  %v2073_v59 = vld [vmem:[%s2770_s1 + $0x1d8] sm:$0xff]  ;;  %v2078_v60 = vld [vmem:[%s2770_s1 + $0x1e0] sm:$0xff] }
  0x18   :  { %v2083_v61 = vld [vmem:[%s2770_s1 + $0x1e8] sm:$0xff]  ;;  %v2088_v62 = vld [vmem:[%s2770_s1 + $0x1f0] sm:$0xff]  ;;  %v2093_v63 = vld [vmem:[%s2770_s1 + $0x1f8] sm:$0xff] }
  0x19   :  { %2835 = vst [vmem:[#allocation25_spill] sm:$0xff] %v2083_v61  ;;  %2836 = vst [vmem:[#allocation26_spill] sm:$0xff] %v2093_v63 }
  0x1a   :  { %181 = vsyncadd [#allocation5], 8192  ;;  %258 = vmatprep.subr.mxu0 %v2083_v61  ;;  %329 = vmatprep.subr.mxu1 %v2093_v63 }
  0x1b   :  { %1757 = dma.done.wait [#allocation5], 8192 }
  0x1c   :  { %1758 = vsyncadd [#allocation5], 4294959104  ;;  %259 = vmatpush1.msra.mxu0 %v2078_v60  ;;  %330 = vmatpush1.msra.mxu1 %v2088_v62 }
  0x1d   :  { %260 = vmatprep.subr.mxu0 %v2063_v57  ;;  %331 = vmatprep.subr.mxu1 %v2073_v59 }
  0x1e   :  { %261 = vmatpush1.msra.mxu0 %v2058_v56  ;;  %332 = vmatpush1.msra.mxu1 %v2068_v58 }
  0x1f   :  { %262 = vmatprep.subr.mxu0 %v2043_v53  ;;  %333 = vmatprep.subr.mxu1 %v2053_v55 }
  0x20   :  { %263 = vmatpush1.msra.mxu0 %v2038_v52  ;;  %334 = vmatpush1.msra.mxu1 %v2048_v54 }
  0x21   :  { %264 = vmatprep.subr.mxu0 %v2023_v49  ;;  %335 = vmatprep.subr.mxu1 %v2033_v51 }
  0x22   :  { %265 = vmatpush1.msra.mxu0 %v2018_v48  ;;  %336 = vmatpush1.msra.mxu1 %v2028_v50 }
  0x23   :  { %266 = vmatprep.subr.mxu0 %v2003_v45  ;;  %337 = vmatprep.subr.mxu1 %v2013_v47 }
  0x24   :  { %267 = vmatpush1.msra.mxu0 %v1998_v44  ;;  %338 = vmatpush1.msra.mxu1 %v2008_v46 }
  0x25   :  { %268 = vmatprep.subr.mxu0 %v1983_v41  ;;  %339 = vmatprep.subr.mxu1 %v1993_v43 }
  0x26   :  { %269 = vmatpush1.msra.mxu0 %v1978_v40  ;;  %340 = vmatpush1.msra.mxu1 %v1988_v42 }
  0x27   :  { %270 = vmatprep.subr.mxu0 %v1963_v37  ;;  %341 = vmatprep.subr.mxu1 %v1973_v39 }
  0x28   :  { %271 = vmatpush1.msra.mxu0 %v1958_v36  ;;  %342 = vmatpush1.msra.mxu1 %v1968_v38 }
  0x29   :  { %272 = vmatprep.subr.mxu0 %v1943_v33  ;;  %343 = vmatprep.subr.mxu1 %v1953_v35 }
  0x2a   :  { %273 = vmatpush1.msra.mxu0 %v1938_v32  ;;  %344 = vmatpush1.msra.mxu1 %v1948_v34 }
  0x2b   :  { %274 = vmatprep.subr.mxu0 %v1923_v29  ;;  %345 = vmatprep.subr.mxu1 %v1933_v31 }
  0x2c   :  { %275 = vmatpush1.msra.mxu0 %v1918_v28  ;;  %346 = vmatpush1.msra.mxu1 %v1928_v30 }
  0x2d   :  { %276 = vmatprep.subr.mxu0 %v1903_v25  ;;  %347 = vmatprep.subr.mxu1 %v1913_v27 }
  0x2e   :  { %277 = vmatpush1.msra.mxu0 %v1898_v24  ;;  %348 = vmatpush1.msra.mxu1 %v1908_v26 }
  0x2f   :  { %278 = vmatprep.subr.mxu0 %v1883_v21  ;;  %349 = vmatprep.subr.mxu1 %v1893_v23  ;;  %v2774_v21 = vmov 0.0  }
  0x30   :  { %279 = vmatpush1.msra.mxu0 %v1878_v20  ;;  %350 = vmatpush1.msra.mxu1 %v1888_v22 }
  0x31   :  { %280 = vmatprep.subr.mxu0 %v1863_v17  ;;  %351 = vmatprep.subr.mxu1 %v1873_v19 }
  0x32   :  { %281 = vmatpush1.msra.mxu0 %v1858_v16  ;;  %352 = vmatpush1.msra.mxu1 %v1868_v18 }
  0x33   :  { %282 = vmatprep.subr.mxu0 %v1843_v13  ;;  %353 = vmatprep.subr.mxu1 %v1853_v15 }
  0x34   :  { %283 = vmatpush1.msra.mxu0 %v1838_v12  ;;  %322 = vmatprep.mubr.f32.mxu0 %v2774_v21 }
  0x35   :  { %284 = vmatprep.subr.mxu0 %v1823_v9  ;;  %354 = vmatpush1.msra.mxu1 %v1848_v14 }
  0x36   :  { %285 = vmatpush1.msra.mxu0 %v1818_v8  ;;  %355 = vmatprep.subr.mxu1 %v1833_v11 }
  0x37   :  { %286 = vmatprep.subr.mxu0 %v1803_v5  ;;  %356 = vmatpush1.msra.mxu1 %v1828_v10 }
  0x38   :  { %287 = vmatpush1.msra.mxu0 %v1798_v4  ;;  %357 = vmatprep.subr.mxu1 %v1813_v7 }
  0x39   :  { %288 = vmatprep.subr.mxu0 %v1783_v1  ;;  %358 = vmatpush1.msra.mxu1 %v1808_v6 }
  0x3a   :  { %289 = vmatpush1.msra.mxu0 %v1778_v0  ;;  %359 = vmatprep.subr.mxu1 %v1793_v3 }
  0x3b   :  { %323 = vmatmul.mubr.f32.vlgmr.msra.gmra.mxu0 %v2774_v21  ;;  %360 = vmatpush1.msra.mxu1 %v1788_v2 }
  0x3c   :  { %393 = vmatprep.mubr.f32.mxu1 %v2774_v21  ;;  %428 = vmatprep.subr.mxu0 %v2083_v61 }
  0x3d   :  { %394 = vmatmul.mubr.f32.vlgmr.msra.gmra.mxu1 %v2774_v21  ;;  %499 = vmatprep.subr.mxu1 %v2093_v63  ;;  %v2837_v21 = vld [vmem:[#allocation24_spill] sm:$0xff] }
  0x3e   :  { %429 = vmatpush1.msra.mxu0 %v2078_v60  ;;  %500 = vmatpush1.msra.mxu1 %v2088_v62 }
  0x3f   :  { %430 = vmatprep.subr.mxu0 %v2063_v57  ;;  %501 = vmatprep.subr.mxu1 %v2073_v59 }
  0x40   :  { %431 = vmatpush1.msra.mxu0 %v2058_v56  ;;  %502 = vmatpush1.msra.mxu1 %v2068_v58 }
  0x41   :  { %432 = vmatprep.subr.mxu0 %v2043_v53  ;;  %503 = vmatprep.subr.mxu1 %v2053_v55 }
  0x42   :  { %433 = vmatpush1.msra.mxu0 %v2038_v52  ;;  %504 = vmatpush1.msra.mxu1 %v2048_v54 }
  0x43   :  { %434 = vmatprep.subr.mxu0 %v2023_v49  ;;  %505 = vmatprep.subr.mxu1 %v2033_v51 }
  0x44   :  { %435 = vmatpush1.msra.mxu0 %v2018_v48  ;;  %506 = vmatpush1.msra.mxu1 %v2028_v50 }
  0x45   :  { %436 = vmatprep.subr.mxu0 %v2003_v45  ;;  %507 = vmatprep.subr.mxu1 %v2013_v47 }
  0x46   :  { %437 = vmatpush1.msra.mxu0 %v1998_v44  ;;  %508 = vmatpush1.msra.mxu1 %v2008_v46 }
  0x47   :  { %438 = vmatprep.subr.mxu0 %v1983_v41  ;;  %509 = vmatprep.subr.mxu1 %v1993_v43 }
  0x48   :  { %439 = vmatpush1.msra.mxu0 %v1978_v40  ;;  %510 = vmatpush1.msra.mxu1 %v1988_v42 }
  0x49   :  { %440 = vmatprep.subr.mxu0 %v1963_v37  ;;  %511 = vmatprep.subr.mxu1 %v1973_v39 }
  0x4a   :  { %441 = vmatpush1.msra.mxu0 %v1958_v36  ;;  %512 = vmatpush1.msra.mxu1 %v1968_v38 }
  0x4b   :  { %442 = vmatprep.subr.mxu0 %v1943_v33  ;;  %513 = vmatprep.subr.mxu1 %v1953_v35 }
  0x4c   :  { %443 = vmatpush1.msra.mxu0 %v1938_v32  ;;  %514 = vmatpush1.msra.mxu1 %v1948_v34 }
  0x4d   :  { %444 = vmatprep.subr.mxu0 %v1923_v29  ;;  %515 = vmatprep.subr.mxu1 %v1933_v31 }
  0x4e   :  { %445 = vmatpush1.msra.mxu0 %v1918_v28  ;;  %516 = vmatpush1.msra.mxu1 %v1928_v30 }
  0x4f   :  { %446 = vmatprep.subr.mxu0 %v1903_v25  ;;  %517 = vmatprep.subr.mxu1 %v1913_v27 }
  0x50   :  { %447 = vmatpush1.msra.mxu0 %v1898_v24  ;;  %518 = vmatpush1.msra.mxu1 %v1908_v26 }
  0x51   :  { %448 = vmatprep.subr.mxu0 %v2837_v21  ;;  %519 = vmatprep.subr.mxu1 %v1893_v23 }
  0x52   :  { %449 = vmatpush1.msra.mxu0 %v1878_v20  ;;  %520 = vmatpush1.msra.mxu1 %v1888_v22 }
  0x53   :  { %450 = vmatprep.subr.mxu0 %v1863_v17  ;;  %521 = vmatprep.subr.mxu1 %v1873_v19 }
  0x54   :  { %451 = vmatpush1.msra.mxu0 %v1858_v16  ;;  %522 = vmatpush1.msra.mxu1 %v1868_v18 }
  0x55   :  { %452 = vmatprep.subr.mxu0 %v1843_v13  ;;  %523 = vmatprep.subr.mxu1 %v1853_v15 }
  0x56   :  { %453 = vmatpush1.msra.mxu0 %v1838_v12  ;;  %524 = vmatpush1.msra.mxu1 %v1848_v14 }
  0x57   :  { %454 = vmatprep.subr.mxu0 %v1823_v9  ;;  %525 = vmatprep.subr.mxu1 %v1833_v11  ;;  %v2838_v9 = vmov 0.0  }
  0x58   :  { %455 = vmatpush1.msra.mxu0 %v1818_v8  ;;  %526 = vmatpush1.msra.mxu1 %v1828_v10  ;;  %v257_v10 = vld [vmem:[%s2769_s0 + $0x18] sm:$0xff] }
  0x59   :  { %456 = vmatprep.subr.mxu0 %v1803_v5  ;;  %527 = vmatprep.subr.mxu1 %v1813_v7 }
  0x5a   :  { %457 = vmatpush1.msra.mxu0 %v1798_v4  ;;  %528 = vmatpush1.msra.mxu1 %v1808_v6  ;;  %v254_v6 = vld [vmem:[%s2769_s0] sm:$0xff] }
  0x5b   :  { %458 = vmatprep.subr.mxu0 %v1783_v1  ;;  %529 = vmatprep.subr.mxu1 %v1793_v3  ;;  %v255_v3 = vld [vmem:[%s2769_s0 + $0x8] sm:$0xff] }
  0x5c   :  { %459 = vmatpush1.msra.mxu0 %v1778_v0  ;;  %492 = vmatprep.mubr.f32.mxu0 %v2838_v9 }
  0x5d   :  { %530 = vmatpush1.msra.mxu1 %v1788_v2  ;;  %563 = vmatprep.mubr.f32.mxu1 %v2838_v9  ;;  %v256_v2 = vld [vmem:[%s2769_s0 + $0x10] sm:$0xff] }
  0x5e   :  { %599 = vmatprep.subr.mxu0 %v2083_v61  ;;  %670 = vmatprep.subr.mxu1 %v2093_v63 }
  0xfb   :  { %v324_v4 = vpop.f32.mrf.mxu0 }
  0xfc   :  { %v400_v0 = vadd.f32 %v324_v4, %v254_v6 }
  0xfd   :  { %v326_v1 = vpop.f32.mrf.mxu0  ;;  %v395_v9 = vpop.f32.mrf.mxu1 }
  0xfe   :  { %v404_v7 = vmul.f32 0.5, %v400_v0  ;;  %v401_v61 = vadd.f32 %v326_v1, %v255_v3  ;;  %v402_v5 = vadd.f32 %v395_v9, %v256_v2 }
  0xff   :  { %v397_v8 = vpop.f32.mrf.mxu1 }
 0x100   :  { %1677 = vtanh.f32 %v404_v7  ;;  %v408_v63 = vmul.f32 0.5, %v401_v61  ;;  %v403_v11 = vadd.f32 %v397_v8, %v257_v10  ;;  %v2839_v10 = vld [vmem:[#allocation21_spill] sm:$0xff] }
 0x102   :  { %1679 = vtanh.f32 %v408_v63  ;;  %v413_v4 = vmul.f32 0.5, %v403_v11  ;;  %v2840_v11 = vld [vmem:[#allocation23_spill] sm:$0xff] }
 0x103   :  { %1681 = vtanh.f32 %v402_v5 }
 0x104   :  { %1683 = vtanh.f32 %v413_v4  ;;  %v2845_v4 = vld [vmem:[#allocation16_spill] sm:$0xff] }
 0x10d   :  { %v1678_v6 = vpop.eup %1677 }
 0x10e   :  { %v406_v14 = vmul.f32 0.5, %v1678_v6  ;;  %v2846_v6 = vld [vmem:[#allocation18_spill] sm:$0xff] }
 0x10f   :  { %v1680_v12 = vpop.eup %1679 }
 0x110   :  { %v407_v15 = vadd.f32 0.5, %v406_v14  ;;  %v410_v13 = vmul.f32 0.5, %v1680_v12  ;;  %v1682_v0 = vpop.eup %1681  ;;  %v2841_v12 = vld [vmem:[#allocation20_spill] sm:$0xff]  ;;  %v2843_v14 = vld [vmem:[#allocation17_spill] sm:$0xff] }
 0x111   :  { %v1684_v5 = vpop.eup %1683 }
 0x112   :  { %v411_v1 = vadd.f32 0.5, %v410_v13  ;;  %v418_v7 = vmul.f32 %v1682_v0, %v407_v15  ;;  %v415_v9 = vmul.f32 0.5, %v1684_v5  ;;  %v2842_v13 = vld [vmem:[#allocation22_spill] sm:$0xff]  ;;  %v2844_v15 = vld [vmem:[#allocation19_spill] sm:$0xff]  ;;  %v2847_v0 = vld [vmem:[#allocation13_spill] sm:$0xff] }
 0x113   :  { %v2851_v5 = vld [vmem:[#allocation9_spill] sm:$0xff] }
 0x114   :  { %v417_v3 = vmul.f32 0.0, %v411_v1  ;;  %v416_v61 = vadd.f32 0.5, %v415_v9  ;;  %v2848_v1 = vld [vmem:[#allocation15_spill] sm:$0xff] }
 0x115   :  { %v2852_v9 = vld [vmem:[#allocation11_spill] sm:$0xff] }
 0x116   :  { %v2243_v2 = vadd.f32 %v418_v7, %v417_v3  ;;  %v2849_v3 = vld [vmem:[#allocation12_spill] sm:$0xff]  ;;  %v2850_v7 = vld [vmem:[#allocation14_spill] sm:$0xff] }
 0x118   :  { %1685 = vtanh.f32 %v2243_v2 }
 0x125   :  { %v1686_v63 = vpop.eup %1685 }
 0x126   :  { %v421_v8 = vmul.f32 %v1686_v63, %v416_v61  ;;  %v2853_v61 = vld [vmem:[#allocation8_spill] sm:$0xff]  ;;  %v2854_v63 = vmov 0.0  }
 0x128   :  { %422 = vst [vmem:[%s2771_s2] sm:$0xff] %v421_v8  ;;  %493 = vmatmul.mubr.f32.vlgmr.msra.gmra.mxu0 %v421_v8  ;;  %564 = vmatmul.mubr.f32.vlgmr.msra.gmra.mxu1 %v421_v8  ;;  %v2855_v8 = vld [vmem:[#allocation10_spill] sm:$0xff] }
 0x129   :  { %600 = vmatpush1.msra.mxu0 %v2078_v60  ;;  %671 = vmatpush1.msra.mxu1 %v2088_v62 }
 0x12a   :  { %601 = vmatprep.subr.mxu0 %v2063_v57  ;;  %672 = vmatprep.subr.mxu1 %v2073_v59 }
 0x12b   :  { %602 = vmatpush1.msra.mxu0 %v2058_v56  ;;  %673 = vmatpush1.msra.mxu1 %v2068_v58 }
 0x12c   :  { %603 = vmatprep.subr.mxu0 %v2043_v53  ;;  %674 = vmatprep.subr.mxu1 %v2053_v55 }
 0x12d   :  { %604 = vmatpush1.msra.mxu0 %v2038_v52  ;;  %675 = vmatpush1.msra.mxu1 %v2048_v54 }
 0x12e   :  { %605 = vmatprep.subr.mxu0 %v2023_v49  ;;  %676 = vmatprep.subr.mxu1 %v2033_v51 }
 0x12f   :  { %606 = vmatpush1.msra.mxu0 %v2018_v48  ;;  %677 = vmatpush1.msra.mxu1 %v2028_v50 }
 0x130   :  { %607 = vmatprep.subr.mxu0 %v2003_v45  ;;  %678 = vmatprep.subr.mxu1 %v2013_v47 }
 0x131   :  { %608 = vmatpush1.msra.mxu0 %v1998_v44  ;;  %679 = vmatpush1.msra.mxu1 %v2008_v46 }
 0x132   :  { %609 = vmatprep.subr.mxu0 %v1983_v41  ;;  %680 = vmatprep.subr.mxu1 %v1993_v43 }
 0x133   :  { %610 = vmatpush1.msra.mxu0 %v1978_v40  ;;  %681 = vmatpush1.msra.mxu1 %v1988_v42 }
 0x134   :  { %611 = vmatprep.subr.mxu0 %v1963_v37  ;;  %682 = vmatprep.subr.mxu1 %v1973_v39 }
 0x135   :  { %612 = vmatpush1.msra.mxu0 %v1958_v36  ;;  %683 = vmatpush1.msra.mxu1 %v1968_v38 }
 0x136   :  { %613 = vmatprep.subr.mxu0 %v1943_v33  ;;  %684 = vmatprep.subr.mxu1 %v1953_v35 }
 0x137   :  { %614 = vmatpush1.msra.mxu0 %v1938_v32  ;;  %685 = vmatpush1.msra.mxu1 %v1948_v34 }
 0x138   :  { %615 = vmatprep.subr.mxu0 %v1923_v29  ;;  %686 = vmatprep.subr.mxu1 %v1933_v31 }
 0x139   :  { %616 = vmatpush1.msra.mxu0 %v1918_v28  ;;  %687 = vmatpush1.msra.mxu1 %v1928_v30 }
 0x13a   :  { %617 = vmatprep.subr.mxu0 %v1903_v25  ;;  %688 = vmatprep.subr.mxu1 %v1913_v27 }
 0x13b   :  { %618 = vmatpush1.msra.mxu0 %v1898_v24  ;;  %689 = vmatpush1.msra.mxu1 %v1908_v26 }
 0x13c   :  { %619 = vmatprep.subr.mxu0 %v2837_v21  ;;  %690 = vmatprep.subr.mxu1 %v1893_v23 }
 0x13d   :  { %620 = vmatpush1.msra.mxu0 %v1878_v20  ;;  %691 = vmatpush1.msra.mxu1 %v1888_v22 }
 0x13e   :  { %621 = vmatprep.subr.mxu0 %v1863_v17  ;;  %692 = vmatprep.subr.mxu1 %v1873_v19 }
 0x13f   :  { %622 = vmatpush1.msra.mxu0 %v1858_v16  ;;  %693 = vmatpush1.msra.mxu1 %v1868_v18 }
 0x140   :  { %623 = vmatprep.subr.mxu0 %v2839_v10  ;;  %694 = vmatprep.subr.mxu1 %v2840_v11 }
 0x141   :  { %624 = vmatpush1.msra.mxu0 %v2841_v12  ;;  %695 = vmatpush1.msra.mxu1 %v2842_v13 }
 0x142   :  { %625 = vmatprep.subr.mxu0 %v2843_v14  ;;  %696 = vmatprep.subr.mxu1 %v2844_v15  ;;  %v1643_v15 = vld [vmem:[%s2769_s0 + $0x38] sm:$0xff] }
 0x143   :  { %626 = vmatpush1.msra.mxu0 %v2845_v4  ;;  %697 = vmatpush1.msra.mxu1 %v2846_v6  ;;  %v2856_v6 = vld [vmem:[#allocation25_spill] sm:$0xff] }
 0x144   :  { %627 = vmatprep.subr.mxu0 %v2847_v0  ;;  %698 = vmatprep.subr.mxu1 %v2848_v1  ;;  %v2857_v0 = vld [vmem:[#allocation26_spill] sm:$0xff] }
 0x145   :  { %628 = vmatpush1.msra.mxu0 %v2849_v3  ;;  %699 = vmatpush1.msra.mxu1 %v2850_v7  ;;  %v1640_v7 = vld [vmem:[%s2769_s0 + $0x20] sm:$0xff] }
 0x146   :  { %629 = vmatprep.subr.mxu0 %v2851_v5  ;;  %700 = vmatprep.subr.mxu1 %v2852_v9  ;;  %v1641_v9 = vld [vmem:[%s2769_s0 + $0x28] sm:$0xff] }
 0x147   :  { %630 = vmatpush1.msra.mxu0 %v2853_v61  ;;  %663 = vmatprep.mubr.f32.mxu0 %v2854_v63 }
 0x148   :  { %701 = vmatpush1.msra.mxu1 %v2855_v8  ;;  %734 = vmatprep.mubr.f32.mxu1 %v2854_v63  ;;  %v1642_v8 = vld [vmem:[%s2769_s0 + $0x30] sm:$0xff] }
 0x149   :  { %770 = vmatprep.subr.mxu0 %v2856_v6  ;;  %841 = vmatprep.subr.mxu1 %v2857_v0 }
 0x1e8   :  { %v494_v3 = vpop.f32.mrf.mxu0  ;;  %v565_v6 = vpop.f32.mrf.mxu1 }
 0x1e9   :  { %v570_v61 = vadd.f32 %v1640_v7, %v494_v3  ;;  %v572_v63 = vadd.f32 %v1642_v8, %v565_v6 }
 0x1ea   :  { %v496_v5 = vpop.f32.mrf.mxu0  ;;  %v567_v14 = vpop.f32.mrf.mxu1 }
 0x1eb   :  { %v574_v1 = vmul.f32 0.5, %v570_v61  ;;  %v571_v4 = vadd.f32 %v1641_v9, %v496_v5  ;;  %v573_v13 = vadd.f32 %v1643_v15, %v567_v14  ;;  %v2862_v15 = vld [vmem:[#allocation17_spill] sm:$0xff] }
 0x1ed   :  { %1687 = vtanh.f32 %v574_v1  ;;  %v578_v0 = vmul.f32 0.5, %v571_v4  ;;  %v583_v3 = vmul.f32 0.5, %v573_v13 }
 0x1ef   :  { %1689 = vtanh.f32 %v578_v0 }
 0x1f0   :  { %1691 = vtanh.f32 %v572_v63 }
 0x1f1   :  { %1693 = vtanh.f32 %v583_v3  ;;  %v2863_v3 = vld [vmem:[#allocation19_spill] sm:$0xff] }
 0x1fa   :  { %v1688_v7 = vpop.eup %1687 }
 0x1fb   :  { %v576_v61 = vmul.f32 0.5, %v1688_v7  ;;  %v2864_v7 = vld [vmem:[#allocation16_spill] sm:$0xff] }
 0x1fc   :  { %v1690_v5 = vpop.eup %1689 }
 0x1fd   :  { %v577_v9 = vadd.f32 0.5, %v576_v61  ;;  %v580_v12 = vmul.f32 0.5, %v1690_v5  ;;  %v1692_v10 = vpop.eup %1691  ;;  %v2865_v61 = vld [vmem:[#allocation18_spill] sm:$0xff]  ;;  %v2866_v5 = vld [vmem:[#allocation13_spill] sm:$0xff] }
 0x1fe   :  { %v1694_v1 = vpop.eup %1693 }
 0x1ff   :  { %v581_v11 = vadd.f32 0.5, %v580_v12  ;;  %v588_v6 = vmul.f32 %v1692_v10, %v577_v9  ;;  %v585_v8 = vmul.f32 0.5, %v1694_v1  ;;  %v2859_v10 = vld [vmem:[#allocation23_spill] sm:$0xff]  ;;  %v2861_v12 = vld [vmem:[#allocation22_spill] sm:$0xff]  ;;  %v2870_v1 = vld [vmem:[#allocation9_spill] sm:$0xff] }
 0x200   :  { %v2867_v9 = vld [vmem:[#allocation15_spill] sm:$0xff] }
 0x201   :  { %v587_v4 = vmul.f32 %v581_v11, %v2243_v2  ;;  %v586_v63 = vadd.f32 0.5, %v585_v8  ;;  %v2858_v2 = vld [vmem:[#allocation21_spill] sm:$0xff]  ;;  %v2860_v11 = vld [vmem:[#allocation20_spill] sm:$0xff]  ;;  %v2871_v8 = vld [vmem:[#allocation11_spill] sm:$0xff] }
 0x203   :  { %v2328_v0 = vadd.f32 %v588_v6, %v587_v4  ;;  %v2868_v4 = vld [vmem:[#allocation12_spill] sm:$0xff]  ;;  %v2869_v6 = vld [vmem:[#allocation14_spill] sm:$0xff] }
 0x205   :  { %1695 = vtanh.f32 %v2328_v0 }
 0x212   :  { %v1696_v14 = vpop.eup %1695 }
 0x213   :  { %v591_v13 = vmul.f32 %v1696_v14, %v586_v63  ;;  %v2872_v63 = vld [vmem:[#allocation8_spill] sm:$0xff]  ;;  %v2873_v14 = vmov 0.0  }
 0x215   :  { %1644 = vst [vmem:[%s2771_s2 + $0x8] sm:$0xff] %v591_v13  ;;  %664 = vmatmul.mubr.f32.vlgmr.msra.gmra.mxu0 %v591_v13  ;;  %735 = vmatmul.mubr.f32.vlgmr.msra.gmra.mxu1 %v591_v13  ;;  %v2874_v13 = vld [vmem:[#allocation10_spill] sm:$0xff] }
 0x216   :  { %771 = vmatpush1.msra.mxu0 %v2078_v60  ;;  %842 = vmatpush1.msra.mxu1 %v2088_v62 }
 0x217   :  { %772 = vmatprep.subr.mxu0 %v2063_v57  ;;  %843 = vmatprep.subr.mxu1 %v2073_v59 }
 0x218   :  { %773 = vmatpush1.msra.mxu0 %v2058_v56  ;;  %844 = vmatpush1.msra.mxu1 %v2068_v58 }
 0x219   :  { %774 = vmatprep.subr.mxu0 %v2043_v53  ;;  %845 = vmatprep.subr.mxu1 %v2053_v55 }
 0x21a   :  { %775 = vmatpush1.msra.mxu0 %v2038_v52  ;;  %846 = vmatpush1.msra.mxu1 %v2048_v54 }
 0x21b   :  { %776 = vmatprep.subr.mxu0 %v2023_v49  ;;  %847 = vmatprep.subr.mxu1 %v2033_v51 }
 0x21c   :  { %777 = vmatpush1.msra.mxu0 %v2018_v48  ;;  %848 = vmatpush1.msra.mxu1 %v2028_v50 }
 0x21d   :  { %778 = vmatprep.subr.mxu0 %v2003_v45  ;;  %849 = vmatprep.subr.mxu1 %v2013_v47 }
 0x21e   :  { %779 = vmatpush1.msra.mxu0 %v1998_v44  ;;  %850 = vmatpush1.msra.mxu1 %v2008_v46 }
 0x21f   :  { %780 = vmatprep.subr.mxu0 %v1983_v41  ;;  %851 = vmatprep.subr.mxu1 %v1993_v43 }
 0x220   :  { %781 = vmatpush1.msra.mxu0 %v1978_v40  ;;  %852 = vmatpush1.msra.mxu1 %v1988_v42 }
 0x221   :  { %782 = vmatprep.subr.mxu0 %v1963_v37  ;;  %853 = vmatprep.subr.mxu1 %v1973_v39 }
 0x222   :  { %783 = vmatpush1.msra.mxu0 %v1958_v36  ;;  %854 = vmatpush1.msra.mxu1 %v1968_v38 }
 0x223   :  { %784 = vmatprep.subr.mxu0 %v1943_v33  ;;  %855 = vmatprep.subr.mxu1 %v1953_v35 }
 0x224   :  { %785 = vmatpush1.msra.mxu0 %v1938_v32  ;;  %856 = vmatpush1.msra.mxu1 %v1948_v34 }
 0x225   :  { %786 = vmatprep.subr.mxu0 %v1923_v29  ;;  %857 = vmatprep.subr.mxu1 %v1933_v31 }
 0x226   :  { %787 = vmatpush1.msra.mxu0 %v1918_v28  ;;  %858 = vmatpush1.msra.mxu1 %v1928_v30 }
 0x227   :  { %788 = vmatprep.subr.mxu0 %v1903_v25  ;;  %859 = vmatprep.subr.mxu1 %v1913_v27 }
 0x228   :  { %789 = vmatpush1.msra.mxu0 %v1898_v24  ;;  %860 = vmatpush1.msra.mxu1 %v1908_v26 }
 0x229   :  { %790 = vmatprep.subr.mxu0 %v2837_v21  ;;  %861 = vmatprep.subr.mxu1 %v1893_v23 }
 0x22a   :  { %791 = vmatpush1.msra.mxu0 %v1878_v20  ;;  %862 = vmatpush1.msra.mxu1 %v1888_v22 }
 0x22b   :  { %792 = vmatprep.subr.mxu0 %v1863_v17  ;;  %863 = vmatprep.subr.mxu1 %v1873_v19 }
 0x22c   :  { %793 = vmatpush1.msra.mxu0 %v1858_v16  ;;  %864 = vmatpush1.msra.mxu1 %v1868_v18 }
 0x22d   :  { %794 = vmatprep.subr.mxu0 %v2858_v2  ;;  %865 = vmatprep.subr.mxu1 %v2859_v10 }
 0x22e   :  { %795 = vmatpush1.msra.mxu0 %v2860_v11  ;;  %866 = vmatpush1.msra.mxu1 %v2861_v12 }
 0x22f   :  { %796 = vmatprep.subr.mxu0 %v2862_v15  ;;  %867 = vmatprep.subr.mxu1 %v2863_v3  ;;  %v1648_v3 = vld [vmem:[%s2769_s0 + $0x58] sm:$0xff] }
 0x230   :  { %797 = vmatpush1.msra.mxu0 %v2864_v7  ;;  %868 = vmatpush1.msra.mxu1 %v2865_v61  ;;  %v2875_v61 = vld [vmem:[#allocation25_spill] sm:$0xff] }
 0x231   :  { %798 = vmatprep.subr.mxu0 %v2866_v5  ;;  %869 = vmatprep.subr.mxu1 %v2867_v9  ;;  %v2876_v5 = vld [vmem:[#allocation26_spill] sm:$0xff] }
 0x232   :  { %799 = vmatpush1.msra.mxu0 %v2868_v4  ;;  %870 = vmatpush1.msra.mxu1 %v2869_v6  ;;  %v1645_v6 = vld [vmem:[%s2769_s0 + $0x40] sm:$0xff] }
 0x233   :  { %800 = vmatprep.subr.mxu0 %v2870_v1  ;;  %871 = vmatprep.subr.mxu1 %v2871_v8  ;;  %v1646_v8 = vld [vmem:[%s2769_s0 + $0x48] sm:$0xff] }
 0x234   :  { %801 = vmatpush1.msra.mxu0 %v2872_v63  ;;  %834 = vmatprep.mubr.f32.mxu0 %v2873_v14 }
 0x235   :  { %872 = vmatpush1.msra.mxu1 %v2874_v13  ;;  %905 = vmatprep.mubr.f32.mxu1 %v2873_v14  ;;  %v1647_v13 = vld [vmem:[%s2769_s0 + $0x50] sm:$0xff] }
 0x236   :  { %941 = vmatprep.subr.mxu0 %v2875_v61  ;;  %1012 = vmatprep.subr.mxu1 %v2876_v5 }
 0x2d5   :  { %v665_v4 = vpop.f32.mrf.mxu0  ;;  %v736_v61 = vpop.f32.mrf.mxu1 }
 0x2d6   :  { %v741_v63 = vadd.f32 %v1645_v6, %v665_v4  ;;  %v743_v14 = vadd.f32 %v1647_v13, %v736_v61 }
 0x2d7   :  { %v667_v1 = vpop.f32.mrf.mxu0  ;;  %v738_v15 = vpop.f32.mrf.mxu1 }
 0x2d8   :  { %v745_v9 = vmul.f32 0.5, %v741_v63  ;;  %v742_v7 = vadd.f32 %v1646_v8, %v667_v1  ;;  %v744_v12 = vadd.f32 %v1648_v3, %v738_v15  ;;  %v2881_v3 = vld [vmem:[#allocation17_spill] sm:$0xff] }
 0x2da   :  { %1697 = vtanh.f32 %v745_v9  ;;  %v749_v5 = vmul.f32 0.5, %v742_v7  ;;  %v754_v4 = vmul.f32 0.5, %v744_v12 }
 0x2dc   :  { %1699 = vtanh.f32 %v749_v5 }
 0x2dd   :  { %1701 = vtanh.f32 %v743_v14 }
 0x2de   :  { %1703 = vtanh.f32 %v754_v4  ;;  %v2882_v4 = vld [vmem:[#allocation19_spill] sm:$0xff] }
 0x2e7   :  { %v1698_v6 = vpop.eup %1697 }
 0x2e8   :  { %v747_v63 = vmul.f32 0.5, %v1698_v6  ;;  %v2883_v6 = vld [vmem:[#allocation16_spill] sm:$0xff] }
 0x2e9   :  { %v1700_v1 = vpop.eup %1699 }
 0x2ea   :  { %v748_v8 = vadd.f32 0.5, %v747_v63  ;;  %v751_v11 = vmul.f32 0.5, %v1700_v1  ;;  %v1702_v2 = vpop.eup %1701  ;;  %v2884_v63 = vld [vmem:[#allocation18_spill] sm:$0xff]  ;;  %v2885_v1 = vld [vmem:[#allocation13_spill] sm:$0xff] }
 0x2eb   :  { %v1704_v9 = vpop.eup %1703 }
 0x2ec   :  { %v752_v10 = vadd.f32 0.5, %v751_v11  ;;  %v759_v61 = vmul.f32 %v1702_v2, %v748_v8  ;;  %v756_v13 = vmul.f32 0.5, %v1704_v9  ;;  %v2878_v2 = vld [vmem:[#allocation23_spill] sm:$0xff]  ;;  %v2880_v11 = vld [vmem:[#allocation22_spill] sm:$0xff]  ;;  %v2889_v9 = vld [vmem:[#allocation9_spill] sm:$0xff] }
 0x2ed   :  { %v2886_v8 = vld [vmem:[#allocation15_spill] sm:$0xff] }
 0x2ee   :  { %v758_v7 = vmul.f32 %v752_v10, %v2328_v0  ;;  %v757_v14 = vadd.f32 0.5, %v756_v13  ;;  %v2877_v0 = vld [vmem:[#allocation21_spill] sm:$0xff]  ;;  %v2879_v10 = vld [vmem:[#allocation20_spill] sm:$0xff]  ;;  %v2890_v13 = vld [vmem:[#allocation11_spill] sm:$0xff] }
 0x2f0   :  { %v2413_v5 = vadd.f32 %v759_v61, %v758_v7  ;;  %v2887_v7 = vld [vmem:[#allocation12_spill] sm:$0xff]  ;;  %v2888_v61 = vld [vmem:[#allocation14_spill] sm:$0xff] }
 0x2f2   :  { %1705 = vtanh.f32 %v2413_v5 }
 0x2ff   :  { %v1706_v15 = vpop.eup %1705 }
 0x300   :  { %v762_v12 = vmul.f32 %v1706_v15, %v757_v14  ;;  %v2891_v14 = vld [vmem:[#allocation8_spill] sm:$0xff]  ;;  %v2892_v15 = vmov 0.0  }
 0x302   :  { %1649 = vst [vmem:[%s2771_s2 + $0x10] sm:$0xff] %v762_v12  ;;  %835 = vmatmul.mubr.f32.vlgmr.msra.gmra.mxu0 %v762_v12  ;;  %906 = vmatmul.mubr.f32.vlgmr.msra.gmra.mxu1 %v762_v12  ;;  %v2893_v12 = vld [vmem:[#allocation10_spill] sm:$0xff] }
 0x303   :  { %942 = vmatpush1.msra.mxu0 %v2078_v60  ;;  %1013 = vmatpush1.msra.mxu1 %v2088_v62 }
 0x304   :  { %943 = vmatprep.subr.mxu0 %v2063_v57  ;;  %1014 = vmatprep.subr.mxu1 %v2073_v59 }
 0x305   :  { %944 = vmatpush1.msra.mxu0 %v2058_v56  ;;  %1015 = vmatpush1.msra.mxu1 %v2068_v58 }
 0x306   :  { %945 = vmatprep.subr.mxu0 %v2043_v53  ;;  %1016 = vmatprep.subr.mxu1 %v2053_v55 }
 0x307   :  { %946 = vmatpush1.msra.mxu0 %v2038_v52  ;;  %1017 = vmatpush1.msra.mxu1 %v2048_v54 }
 0x308   :  { %947 = vmatprep.subr.mxu0 %v2023_v49  ;;  %1018 = vmatprep.subr.mxu1 %v2033_v51 }
 0x309   :  { %948 = vmatpush1.msra.mxu0 %v2018_v48  ;;  %1019 = vmatpush1.msra.mxu1 %v2028_v50 }
 0x30a   :  { %949 = vmatprep.subr.mxu0 %v2003_v45  ;;  %1020 = vmatprep.subr.mxu1 %v2013_v47 }
 0x30b   :  { %950 = vmatpush1.msra.mxu0 %v1998_v44  ;;  %1021 = vmatpush1.msra.mxu1 %v2008_v46 }
 0x30c   :  { %951 = vmatprep.subr.mxu0 %v1983_v41  ;;  %1022 = vmatprep.subr.mxu1 %v1993_v43 }
 0x30d   :  { %952 = vmatpush1.msra.mxu0 %v1978_v40  ;;  %1023 = vmatpush1.msra.mxu1 %v1988_v42 }
 0x30e   :  { %953 = vmatprep.subr.mxu0 %v1963_v37  ;;  %1024 = vmatprep.subr.mxu1 %v1973_v39 }
 0x30f   :  { %954 = vmatpush1.msra.mxu0 %v1958_v36  ;;  %1025 = vmatpush1.msra.mxu1 %v1968_v38 }
 0x310   :  { %955 = vmatprep.subr.mxu0 %v1943_v33  ;;  %1026 = vmatprep.subr.mxu1 %v1953_v35 }
 0x311   :  { %956 = vmatpush1.msra.mxu0 %v1938_v32  ;;  %1027 = vmatpush1.msra.mxu1 %v1948_v34 }
 0x312   :  { %957 = vmatprep.subr.mxu0 %v1923_v29  ;;  %1028 = vmatprep.subr.mxu1 %v1933_v31 }
 0x313   :  { %958 = vmatpush1.msra.mxu0 %v1918_v28  ;;  %1029 = vmatpush1.msra.mxu1 %v1928_v30 }
 0x314   :  { %959 = vmatprep.subr.mxu0 %v1903_v25  ;;  %1030 = vmatprep.subr.mxu1 %v1913_v27 }
 0x315   :  { %960 = vmatpush1.msra.mxu0 %v1898_v24  ;;  %1031 = vmatpush1.msra.mxu1 %v1908_v26 }
 0x316   :  { %961 = vmatprep.subr.mxu0 %v2837_v21  ;;  %1032 = vmatprep.subr.mxu1 %v1893_v23 }
 0x317   :  { %962 = vmatpush1.msra.mxu0 %v1878_v20  ;;  %1033 = vmatpush1.msra.mxu1 %v1888_v22 }
 0x318   :  { %963 = vmatprep.subr.mxu0 %v1863_v17  ;;  %1034 = vmatprep.subr.mxu1 %v1873_v19 }
 0x319   :  { %964 = vmatpush1.msra.mxu0 %v1858_v16  ;;  %1035 = vmatpush1.msra.mxu1 %v1868_v18 }
 0x31a   :  { %965 = vmatprep.subr.mxu0 %v2877_v0  ;;  %1036 = vmatprep.subr.mxu1 %v2878_v2 }
 0x31b   :  { %966 = vmatpush1.msra.mxu0 %v2879_v10  ;;  %1037 = vmatpush1.msra.mxu1 %v2880_v11 }
 0x31c   :  { %967 = vmatprep.subr.mxu0 %v2881_v3  ;;  %1038 = vmatprep.subr.mxu1 %v2882_v4  ;;  %v1653_v4 = vld [vmem:[%s2769_s0 + $0x78] sm:$0xff] }
 0x31d   :  { %968 = vmatpush1.msra.mxu0 %v2883_v6  ;;  %1039 = vmatpush1.msra.mxu1 %v2884_v63  ;;  %v2894_v63 = vld [vmem:[#allocation25_spill] sm:$0xff] }
 0x31e   :  { %969 = vmatprep.subr.mxu0 %v2885_v1  ;;  %1040 = vmatprep.subr.mxu1 %v2886_v8  ;;  %v2895_v1 = vld [vmem:[#allocation26_spill] sm:$0xff] }
 0x31f   :  { %970 = vmatpush1.msra.mxu0 %v2887_v7  ;;  %1041 = vmatpush1.msra.mxu1 %v2888_v61  ;;  %v1650_v61 = vld [vmem:[%s2769_s0 + $0x60] sm:$0xff] }
 0x320   :  { %971 = vmatprep.subr.mxu0 %v2889_v9  ;;  %1042 = vmatprep.subr.mxu1 %v2890_v13  ;;  %v1651_v13 = vld [vmem:[%s2769_s0 + $0x68] sm:$0xff] }
 0x321   :  { %972 = vmatpush1.msra.mxu0 %v2891_v14  ;;  %1005 = vmatprep.mubr.f32.mxu0 %v2892_v15 }
 0x322   :  { %1043 = vmatpush1.msra.mxu1 %v2893_v12  ;;  %1076 = vmatprep.mubr.f32.mxu1 %v2892_v15  ;;  %v1652_v12 = vld [vmem:[%s2769_s0 + $0x70] sm:$0xff] }
 0x323   :  { %1112 = vmatprep.subr.mxu0 %v2894_v63  ;;  %1183 = vmatprep.subr.mxu1 %v2895_v1 }
 0x3c2   :  { %v836_v7 = vpop.f32.mrf.mxu0  ;;  %v907_v63 = vpop.f32.mrf.mxu1 }
 0x3c3   :  { %v912_v14 = vadd.f32 %v1650_v61, %v836_v7  ;;  %v914_v15 = vadd.f32 %v1652_v12, %v907_v63 }
 0x3c4   :  { %v838_v9 = vpop.f32.mrf.mxu0  ;;  %v909_v3 = vpop.f32.mrf.mxu1 }
 0x3c5   :  { %v916_v8 = vmul.f32 0.5, %v912_v14  ;;  %v913_v6 = vadd.f32 %v1651_v13, %v838_v9  ;;  %v915_v11 = vadd.f32 %v1653_v4, %v909_v3  ;;  %v2900_v4 = vld [vmem:[#allocation17_spill] sm:$0xff] }
 0x3c7   :  { %1707 = vtanh.f32 %v916_v8  ;;  %v920_v1 = vmul.f32 0.5, %v913_v6  ;;  %v925_v7 = vmul.f32 0.5, %v915_v11 }
 0x3c9   :  { %1709 = vtanh.f32 %v920_v1 }
 0x3ca   :  { %1711 = vtanh.f32 %v914_v15 }
 0x3cb   :  { %1713 = vtanh.f32 %v925_v7  ;;  %v2901_v7 = vld [vmem:[#allocation19_spill] sm:$0xff] }
 0x3d4   :  { %v1708_v61 = vpop.eup %1707 }
 0x3d5   :  { %v918_v14 = vmul.f32 0.5, %v1708_v61  ;;  %v2902_v61 = vld [vmem:[#allocation16_spill] sm:$0xff] }
 0x3d6   :  { %v1710_v9 = vpop.eup %1709 }
 0x3d7   :  { %v919_v13 = vadd.f32 0.5, %v918_v14  ;;  %v922_v10 = vmul.f32 0.5, %v1710_v9  ;;  %v1712_v0 = vpop.eup %1711  ;;  %v2903_v14 = vld [vmem:[#allocation18_spill] sm:$0xff]  ;;  %v2904_v9 = vld [vmem:[#allocation13_spill] sm:$0xff] }
 0x3d8   :  { %v1714_v8 = vpop.eup %1713 }
 0x3d9   :  { %v923_v2 = vadd.f32 0.5, %v922_v10  ;;  %v930_v63 = vmul.f32 %v1712_v0, %v919_v13  ;;  %v927_v12 = vmul.f32 0.5, %v1714_v8  ;;  %v2897_v0 = vld [vmem:[#allocation23_spill] sm:$0xff]  ;;  %v2899_v10 = vld [vmem:[#allocation22_spill] sm:$0xff]  ;;  %v2908_v8 = vld [vmem:[#allocation9_spill] sm:$0xff] }
 0x3da   :  { %v2905_v13 = vld [vmem:[#allocation15_spill] sm:$0xff] }
 0x3db   :  { %v929_v6 = vmul.f32 %v923_v2, %v2413_v5  ;;  %v928_v15 = vadd.f32 0.5, %v927_v12  ;;  %v2896_v5 = vld [vmem:[#allocation21_spill] sm:$0xff]  ;;  %v2898_v2 = vld [vmem:[#allocation20_spill] sm:$0xff]  ;;  %v2909_v12 = vld [vmem:[#allocation11_spill] sm:$0xff] }
 0x3dd   :  { %v2498_v1 = vadd.f32 %v930_v63, %v929_v6  ;;  %v2906_v6 = vld [vmem:[#allocation12_spill] sm:$0xff]  ;;  %v2907_v63 = vld [vmem:[#allocation14_spill] sm:$0xff] }
 0x3df   :  { %1715 = vtanh.f32 %v2498_v1 }
 0x3ec   :  { %v1716_v3 = vpop.eup %1715 }
 0x3ed   :  { %v933_v11 = vmul.f32 %v1716_v3, %v928_v15  ;;  %v2910_v15 = vld [vmem:[#allocation8_spill] sm:$0xff]  ;;  %v2911_v3 = vmov 0.0  }
 0x3ef   :  { %1654 = vst [vmem:[%s2771_s2 + $0x18] sm:$0xff] %v933_v11  ;;  %1006 = vmatmul.mubr.f32.vlgmr.msra.gmra.mxu0 %v933_v11  ;;  %1077 = vmatmul.mubr.f32.vlgmr.msra.gmra.mxu1 %v933_v11  ;;  %v2912_v11 = vld [vmem:[#allocation10_spill] sm:$0xff] }
 0x3f0   :  { %1113 = vmatpush1.msra.mxu0 %v2078_v60  ;;  %1184 = vmatpush1.msra.mxu1 %v2088_v62 }
 0x3f1   :  { %1114 = vmatprep.subr.mxu0 %v2063_v57  ;;  %1185 = vmatprep.subr.mxu1 %v2073_v59 }
 0x3f2   :  { %1115 = vmatpush1.msra.mxu0 %v2058_v56  ;;  %1186 = vmatpush1.msra.mxu1 %v2068_v58 }
 0x3f3   :  { %1116 = vmatprep.subr.mxu0 %v2043_v53  ;;  %1187 = vmatprep.subr.mxu1 %v2053_v55 }
 0x3f4   :  { %1117 = vmatpush1.msra.mxu0 %v2038_v52  ;;  %1188 = vmatpush1.msra.mxu1 %v2048_v54 }
 0x3f5   :  { %1118 = vmatprep.subr.mxu0 %v2023_v49  ;;  %1189 = vmatprep.subr.mxu1 %v2033_v51 }
 0x3f6   :  { %1119 = vmatpush1.msra.mxu0 %v2018_v48  ;;  %1190 = vmatpush1.msra.mxu1 %v2028_v50 }
 0x3f7   :  { %1120 = vmatprep.subr.mxu0 %v2003_v45  ;;  %1191 = vmatprep.subr.mxu1 %v2013_v47 }
 0x3f8   :  { %1121 = vmatpush1.msra.mxu0 %v1998_v44  ;;  %1192 = vmatpush1.msra.mxu1 %v2008_v46 }
 0x3f9   :  { %1122 = vmatprep.subr.mxu0 %v1983_v41  ;;  %1193 = vmatprep.subr.mxu1 %v1993_v43 }
 0x3fa   :  { %1123 = vmatpush1.msra.mxu0 %v1978_v40  ;;  %1194 = vmatpush1.msra.mxu1 %v1988_v42 }
 0x3fb   :  { %1124 = vmatprep.subr.mxu0 %v1963_v37  ;;  %1195 = vmatprep.subr.mxu1 %v1973_v39 }
 0x3fc   :  { %1125 = vmatpush1.msra.mxu0 %v1958_v36  ;;  %1196 = vmatpush1.msra.mxu1 %v1968_v38 }
 0x3fd   :  { %1126 = vmatprep.subr.mxu0 %v1943_v33  ;;  %1197 = vmatprep.subr.mxu1 %v1953_v35 }
 0x3fe   :  { %1127 = vmatpush1.msra.mxu0 %v1938_v32  ;;  %1198 = vmatpush1.msra.mxu1 %v1948_v34 }
 0x3ff   :  { %1128 = vmatprep.subr.mxu0 %v1923_v29  ;;  %1199 = vmatprep.subr.mxu1 %v1933_v31 }
 0x400   :  { %1129 = vmatpush1.msra.mxu0 %v1918_v28  ;;  %1200 = vmatpush1.msra.mxu1 %v1928_v30 }
 0x401   :  { %1130 = vmatprep.subr.mxu0 %v1903_v25  ;;  %1201 = vmatprep.subr.mxu1 %v1913_v27 }
 0x402   :  { %1131 = vmatpush1.msra.mxu0 %v1898_v24  ;;  %1202 = vmatpush1.msra.mxu1 %v1908_v26 }
 0x403   :  { %1132 = vmatprep.subr.mxu0 %v2837_v21  ;;  %1203 = vmatprep.subr.mxu1 %v1893_v23 }
 0x404   :  { %1133 = vmatpush1.msra.mxu0 %v1878_v20  ;;  %1204 = vmatpush1.msra.mxu1 %v1888_v22 }
 0x405   :  { %1134 = vmatprep.subr.mxu0 %v1863_v17  ;;  %1205 = vmatprep.subr.mxu1 %v1873_v19 }
 0x406   :  { %1135 = vmatpush1.msra.mxu0 %v1858_v16  ;;  %1206 = vmatpush1.msra.mxu1 %v1868_v18 }
 0x407   :  { %1136 = vmatprep.subr.mxu0 %v2896_v5  ;;  %1207 = vmatprep.subr.mxu1 %v2897_v0 }
 0x408   :  { %1137 = vmatpush1.msra.mxu0 %v2898_v2  ;;  %1208 = vmatpush1.msra.mxu1 %v2899_v10 }
 0x409   :  { %1138 = vmatprep.subr.mxu0 %v2900_v4  ;;  %1209 = vmatprep.subr.mxu1 %v2901_v7  ;;  %v1658_v7 = vld [vmem:[%s2769_s0 + $0x98] sm:$0xff] }
 0x40a   :  { %1139 = vmatpush1.msra.mxu0 %v2902_v61  ;;  %1210 = vmatpush1.msra.mxu1 %v2903_v14  ;;  %v2913_v14 = vld [vmem:[#allocation25_spill] sm:$0xff] }
 0x40b   :  { %1140 = vmatprep.subr.mxu0 %v2904_v9  ;;  %1211 = vmatprep.subr.mxu1 %v2905_v13  ;;  %v2914_v9 = vld [vmem:[#allocation26_spill] sm:$0xff] }
 0x40c   :  { %1141 = vmatpush1.msra.mxu0 %v2906_v6  ;;  %1212 = vmatpush1.msra.mxu1 %v2907_v63  ;;  %v1655_v63 = vld [vmem:[%s2769_s0 + $0x80] sm:$0xff] }
 0x40d   :  { %1142 = vmatprep.subr.mxu0 %v2908_v8  ;;  %1213 = vmatprep.subr.mxu1 %v2909_v12  ;;  %v1656_v12 = vld [vmem:[%s2769_s0 + $0x88] sm:$0xff] }
 0x40e   :  { %1143 = vmatpush1.msra.mxu0 %v2910_v15  ;;  %1176 = vmatprep.mubr.f32.mxu0 %v2911_v3 }
 0x40f   :  { %1214 = vmatpush1.msra.mxu1 %v2912_v11  ;;  %1247 = vmatprep.mubr.f32.mxu1 %v2911_v3  ;;  %v1657_v11 = vld [vmem:[%s2769_s0 + $0x90] sm:$0xff] }
 0x410   :  { %1283 = vmatprep.subr.mxu0 %v2913_v14  ;;  %1354 = vmatprep.subr.mxu1 %v2914_v9 }
 0x4af   :  { %v1007_v6 = vpop.f32.mrf.mxu0  ;;  %v1078_v14 = vpop.f32.mrf.mxu1 }
 0x4b0   :  { %v1083_v15 = vadd.f32 %v1655_v63, %v1007_v6  ;;  %v1085_v3 = vadd.f32 %v1657_v11, %v1078_v14 }
 0x4b1   :  { %v1009_v8 = vpop.f32.mrf.mxu0  ;;  %v1080_v4 = vpop.f32.mrf.mxu1 }
 0x4b2   :  { %v1087_v13 = vmul.f32 0.5, %v1083_v15  ;;  %v1084_v61 = vadd.f32 %v1656_v12, %v1009_v8  ;;  %v1086_v10 = vadd.f32 %v1658_v7, %v1080_v4  ;;  %v2919_v7 = vld [vmem:[#allocation17_spill] sm:$0xff] }
 0x4b4   :  { %1717 = vtanh.f32 %v1087_v13  ;;  %v1091_v9 = vmul.f32 0.5, %v1084_v61  ;;  %v1096_v6 = vmul.f32 0.5, %v1086_v10 }
 0x4b6   :  { %1719 = vtanh.f32 %v1091_v9 }
 0x4b7   :  { %1721 = vtanh.f32 %v1085_v3 }
 0x4b8   :  { %1723 = vtanh.f32 %v1096_v6  ;;  %v2920_v6 = vld [vmem:[#allocation19_spill] sm:$0xff] }
 0x4c1   :  { %v1718_v63 = vpop.eup %1717 }
 0x4c2   :  { %v1089_v15 = vmul.f32 0.5, %v1718_v63  ;;  %v2921_v63 = vld [vmem:[#allocation16_spill] sm:$0xff] }
 0x4c3   :  { %v1720_v8 = vpop.eup %1719 }
 0x4c4   :  { %v1090_v12 = vadd.f32 0.5, %v1089_v15  ;;  %v1093_v2 = vmul.f32 0.5, %v1720_v8  ;;  %v1722_v5 = vpop.eup %1721  ;;  %v2922_v15 = vld [vmem:[#allocation18_spill] sm:$0xff]  ;;  %v2923_v8 = vld [vmem:[#allocation13_spill] sm:$0xff] }
 0x4c5   :  { %v1724_v13 = vpop.eup %1723 }
 0x4c6   :  { %v1094_v0 = vadd.f32 0.5, %v1093_v2  ;;  %v1101_v14 = vmul.f32 %v1722_v5, %v1090_v12  ;;  %v1098_v11 = vmul.f32 0.5, %v1724_v13  ;;  %v2916_v5 = vld [vmem:[#allocation23_spill] sm:$0xff]  ;;  %v2918_v2 = vld [vmem:[#allocation22_spill] sm:$0xff]  ;;  %v2927_v13 = vld [vmem:[#allocation9_spill] sm:$0xff] }
 0x4c7   :  { %v2924_v12 = vld [vmem:[#allocation15_spill] sm:$0xff] }
 0x4c8   :  { %v1100_v61 = vmul.f32 %v1094_v0, %v2498_v1  ;;  %v1099_v3 = vadd.f32 0.5, %v1098_v11  ;;  %v2915_v1 = vld [vmem:[#allocation21_spill] sm:$0xff]  ;;  %v2917_v0 = vld [vmem:[#allocation20_spill] sm:$0xff]  ;;  %v2928_v11 = vld [vmem:[#allocation11_spill] sm:$0xff] }
 0x4ca   :  { %v2583_v9 = vadd.f32 %v1101_v14, %v1100_v61  ;;  %v2925_v61 = vld [vmem:[#allocation12_spill] sm:$0xff]  ;;  %v2926_v14 = vld [vmem:[#allocation14_spill] sm:$0xff] }
 0x4cc   :  { %1725 = vtanh.f32 %v2583_v9 }
 0x4d9   :  { %v1726_v4 = vpop.eup %1725 }
 0x4da   :  { %v1104_v10 = vmul.f32 %v1726_v4, %v1099_v3  ;;  %v2929_v3 = vld [vmem:[#allocation8_spill] sm:$0xff]  ;;  %v2930_v4 = vmov 0.0  }
 0x4dc   :  { %1659 = vst [vmem:[%s2771_s2 + $0x20] sm:$0xff] %v1104_v10  ;;  %1177 = vmatmul.mubr.f32.vlgmr.msra.gmra.mxu0 %v1104_v10  ;;  %1248 = vmatmul.mubr.f32.vlgmr.msra.gmra.mxu1 %v1104_v10  ;;  %v2931_v10 = vld [vmem:[#allocation10_spill] sm:$0xff] }
 0x4dd   :  { %1284 = vmatpush1.msra.mxu0 %v2078_v60  ;;  %1355 = vmatpush1.msra.mxu1 %v2088_v62 }
 0x4de   :  { %1285 = vmatprep.subr.mxu0 %v2063_v57  ;;  %1356 = vmatprep.subr.mxu1 %v2073_v59 }
 0x4df   :  { %1286 = vmatpush1.msra.mxu0 %v2058_v56  ;;  %1357 = vmatpush1.msra.mxu1 %v2068_v58 }
 0x4e0   :  { %1287 = vmatprep.subr.mxu0 %v2043_v53  ;;  %1358 = vmatprep.subr.mxu1 %v2053_v55 }
 0x4e1   :  { %1288 = vmatpush1.msra.mxu0 %v2038_v52  ;;  %1359 = vmatpush1.msra.mxu1 %v2048_v54 }
 0x4e2   :  { %1289 = vmatprep.subr.mxu0 %v2023_v49  ;;  %1360 = vmatprep.subr.mxu1 %v2033_v51 }
 0x4e3   :  { %1290 = vmatpush1.msra.mxu0 %v2018_v48  ;;  %1361 = vmatpush1.msra.mxu1 %v2028_v50 }
 0x4e4   :  { %1291 = vmatprep.subr.mxu0 %v2003_v45  ;;  %1362 = vmatprep.subr.mxu1 %v2013_v47 }
 0x4e5   :  { %1292 = vmatpush1.msra.mxu0 %v1998_v44  ;;  %1363 = vmatpush1.msra.mxu1 %v2008_v46 }
 0x4e6   :  { %1293 = vmatprep.subr.mxu0 %v1983_v41  ;;  %1364 = vmatprep.subr.mxu1 %v1993_v43 }
 0x4e7   :  { %1294 = vmatpush1.msra.mxu0 %v1978_v40  ;;  %1365 = vmatpush1.msra.mxu1 %v1988_v42 }
 0x4e8   :  { %1295 = vmatprep.subr.mxu0 %v1963_v37  ;;  %1366 = vmatprep.subr.mxu1 %v1973_v39 }
 0x4e9   :  { %1296 = vmatpush1.msra.mxu0 %v1958_v36  ;;  %1367 = vmatpush1.msra.mxu1 %v1968_v38 }
 0x4ea   :  { %1297 = vmatprep.subr.mxu0 %v1943_v33  ;;  %1368 = vmatprep.subr.mxu1 %v1953_v35 }
 0x4eb   :  { %1298 = vmatpush1.msra.mxu0 %v1938_v32  ;;  %1369 = vmatpush1.msra.mxu1 %v1948_v34 }
 0x4ec   :  { %1299 = vmatprep.subr.mxu0 %v1923_v29  ;;  %1370 = vmatprep.subr.mxu1 %v1933_v31 }
 0x4ed   :  { %1300 = vmatpush1.msra.mxu0 %v1918_v28  ;;  %1371 = vmatpush1.msra.mxu1 %v1928_v30 }
 0x4ee   :  { %1301 = vmatprep.subr.mxu0 %v1903_v25  ;;  %1372 = vmatprep.subr.mxu1 %v1913_v27 }
 0x4ef   :  { %1302 = vmatpush1.msra.mxu0 %v1898_v24  ;;  %1373 = vmatpush1.msra.mxu1 %v1908_v26 }
 0x4f0   :  { %1303 = vmatprep.subr.mxu0 %v2837_v21  ;;  %1374 = vmatprep.subr.mxu1 %v1893_v23 }
 0x4f1   :  { %1304 = vmatpush1.msra.mxu0 %v1878_v20  ;;  %1375 = vmatpush1.msra.mxu1 %v1888_v22 }
 0x4f2   :  { %1305 = vmatprep.subr.mxu0 %v1863_v17  ;;  %1376 = vmatprep.subr.mxu1 %v1873_v19 }
 0x4f3   :  { %1306 = vmatpush1.msra.mxu0 %v1858_v16  ;;  %1377 = vmatpush1.msra.mxu1 %v1868_v18 }
 0x4f4   :  { %1307 = vmatprep.subr.mxu0 %v2915_v1  ;;  %1378 = vmatprep.subr.mxu1 %v2916_v5 }
 0x4f5   :  { %1308 = vmatpush1.msra.mxu0 %v2917_v0  ;;  %1379 = vmatpush1.msra.mxu1 %v2918_v2 }
 0x4f6   :  { %1309 = vmatprep.subr.mxu0 %v2919_v7  ;;  %1380 = vmatprep.subr.mxu1 %v2920_v6  ;;  %v1663_v6 = vld [vmem:[%s2769_s0 + $0xb8] sm:$0xff] }
 0x4f7   :  { %1310 = vmatpush1.msra.mxu0 %v2921_v63  ;;  %1381 = vmatpush1.msra.mxu1 %v2922_v15  ;;  %v2932_v15 = vld [vmem:[#allocation25_spill] sm:$0xff] }
 0x4f8   :  { %1311 = vmatprep.subr.mxu0 %v2923_v8  ;;  %1382 = vmatprep.subr.mxu1 %v2924_v12  ;;  %v2933_v8 = vld [vmem:[#allocation26_spill] sm:$0xff] }
 0x4f9   :  { %1312 = vmatpush1.msra.mxu0 %v2925_v61  ;;  %1383 = vmatpush1.msra.mxu1 %v2926_v14  ;;  %v1660_v14 = vld [vmem:[%s2769_s0 + $0xa0] sm:$0xff] }
 0x4fa   :  { %1313 = vmatprep.subr.mxu0 %v2927_v13  ;;  %1384 = vmatprep.subr.mxu1 %v2928_v11  ;;  %v1661_v11 = vld [vmem:[%s2769_s0 + $0xa8] sm:$0xff] }
 0x4fb   :  { %1314 = vmatpush1.msra.mxu0 %v2929_v3  ;;  %1347 = vmatprep.mubr.f32.mxu0 %v2930_v4 }
 0x4fc   :  { %1385 = vmatpush1.msra.mxu1 %v2931_v10  ;;  %1418 = vmatprep.mubr.f32.mxu1 %v2930_v4  ;;  %v1662_v10 = vld [vmem:[%s2769_s0 + $0xb0] sm:$0xff] }
 0x4fd   :  { %1454 = vmatprep.subr.mxu0 %v2932_v15  ;;  %1525 = vmatprep.subr.mxu1 %v2933_v8 }
 0x59c   :  { %v1178_v61 = vpop.f32.mrf.mxu0  ;;  %v1249_v15 = vpop.f32.mrf.mxu1 }
 0x59d   :  { %v1254_v3 = vadd.f32 %v1660_v14, %v1178_v61  ;;  %v1256_v4 = vadd.f32 %v1662_v10, %v1249_v15 }
 0x59e   :  { %v1180_v13 = vpop.f32.mrf.mxu0  ;;  %v1251_v7 = vpop.f32.mrf.mxu1 }
 0x59f   :  { %v1258_v12 = vmul.f32 0.5, %v1254_v3  ;;  %v1255_v63 = vadd.f32 %v1661_v11, %v1180_v13  ;;  %v1257_v2 = vadd.f32 %v1663_v6, %v1251_v7 }
 0x5a1   :  { %1727 = vtanh.f32 %v1258_v12  ;;  %v1262_v8 = vmul.f32 0.5, %v1255_v63  ;;  %v1267_v61 = vmul.f32 0.5, %v1257_v2 }
 0x5a3   :  { %1729 = vtanh.f32 %v1262_v8 }
 0x5a4   :  { %1731 = vtanh.f32 %v1256_v4 }
 0x5a5   :  { %1733 = vtanh.f32 %v1267_v61 }
 0x5ae   :  { %v1728_v14 = vpop.eup %1727 }
 0x5af   :  { %v1260_v3 = vmul.f32 0.5, %v1728_v14 }
 0x5b0   :  { %v1730_v13 = vpop.eup %1729 }
 0x5b1   :  { %v1261_v11 = vadd.f32 0.5, %v1260_v3  ;;  %v1264_v0 = vmul.f32 0.5, %v1730_v13  ;;  %v1732_v1 = vpop.eup %1731  ;;  %v1672_v13 = vld [vmem:[%s2769_s0 + $0xf0] sm:$0xff] }
 0x5b2   :  { %v1734_v15 = vpop.eup %1733 }
 0x5b3   :  { %v1265_v5 = vadd.f32 0.5, %v1264_v0  ;;  %v1272_v12 = vmul.f32 %v1732_v1, %v1261_v11  ;;  %v1269_v8 = vmul.f32 0.5, %v1734_v15  ;;  %v1670_v1 = vld [vmem:[%s2769_s0 + $0xe0] sm:$0xff]  ;;  %v1671_v0 = vld [vmem:[%s2769_s0 + $0xe8] sm:$0xff] }
 0x5b5   :  { %v1271_v63 = vmul.f32 %v1265_v5, %v2583_v9  ;;  %v1270_v4 = vadd.f32 0.5, %v1269_v8 }
 0x5b7   :  { %v2668_v10 = vadd.f32 %v1272_v12, %v1271_v63 }
 0x5b9   :  { %1735 = vtanh.f32 %v2668_v10 }
 0x5c6   :  { %v1736_v7 = vpop.eup %1735 }
 0x5c7   :  { %v1275_v2 = vmul.f32 %v1736_v7, %v1270_v4 }
 0x5c9   :  { %1664 = vst [vmem:[%s2771_s2 + $0x28] sm:$0xff] %v1275_v2  ;;  %1348 = vmatmul.mubr.f32.vlgmr.msra.gmra.mxu0 %v1275_v2  ;;  %1419 = vmatmul.mubr.f32.vlgmr.msra.gmra.mxu1 %v1275_v2 }
 0x5ca   :  { %1455 = vmatpush1.msra.mxu0 %v2078_v60  ;;  %1526 = vmatpush1.msra.mxu1 %v2088_v62 }
 0x5cb   :  { %1456 = vmatprep.subr.mxu0 %v2063_v57  ;;  %1527 = vmatprep.subr.mxu1 %v2073_v59 }
 0x5cc   :  { %1457 = vmatpush1.msra.mxu0 %v2058_v56  ;;  %1528 = vmatpush1.msra.mxu1 %v2068_v58 }
 0x5cd   :  { %1458 = vmatprep.subr.mxu0 %v2043_v53  ;;  %1529 = vmatprep.subr.mxu1 %v2053_v55 }
 0x5ce   :  { %1459 = vmatpush1.msra.mxu0 %v2038_v52  ;;  %1530 = vmatpush1.msra.mxu1 %v2048_v54 }
 0x5cf   :  { %1460 = vmatprep.subr.mxu0 %v2023_v49  ;;  %1531 = vmatprep.subr.mxu1 %v2033_v51 }
 0x5d0   :  { %1461 = vmatpush1.msra.mxu0 %v2018_v48  ;;  %1532 = vmatpush1.msra.mxu1 %v2028_v50 }
 0x5d1   :  { %1462 = vmatprep.subr.mxu0 %v2003_v45  ;;  %1533 = vmatprep.subr.mxu1 %v2013_v47 }
 0x5d2   :  { %1463 = vmatpush1.msra.mxu0 %v1998_v44  ;;  %1534 = vmatpush1.msra.mxu1 %v2008_v46  ;;  %v1668_v44 = vld [vmem:[%s2769_s0 + $0xd8] sm:$0xff] }
 0x5d3   :  { %1464 = vmatprep.subr.mxu0 %v1983_v41  ;;  %1535 = vmatprep.subr.mxu1 %v1993_v43 }
 0x5d4   :  { %1465 = vmatpush1.msra.mxu0 %v1978_v40  ;;  %1536 = vmatpush1.msra.mxu1 %v1988_v42  ;;  %v1667_v40 = vld [vmem:[%s2769_s0 + $0xd0] sm:$0xff] }
 0x5d5   :  { %1466 = vmatprep.subr.mxu0 %v1963_v37  ;;  %1537 = vmatprep.subr.mxu1 %v1973_v39 }
 0x5d6   :  { %1467 = vmatpush1.msra.mxu0 %v1958_v36  ;;  %1538 = vmatpush1.msra.mxu1 %v1968_v38 }
 0x5d7   :  { %1468 = vmatprep.subr.mxu0 %v1943_v33  ;;  %1539 = vmatprep.subr.mxu1 %v1953_v35  ;;  %v1665_v33 = vld [vmem:[%s2769_s0 + $0xc0] sm:$0xff]  ;;  %v1666_v35 = vld [vmem:[%s2769_s0 + $0xc8] sm:$0xff] }
 0x5d8   :  { %1469 = vmatpush1.msra.mxu0 %v1938_v32  ;;  %1540 = vmatpush1.msra.mxu1 %v1948_v34  ;;  %v2950_v32 = vld [vmem:[#allocation10_spill] sm:$0xff] }
 0x5d9   :  { %1470 = vmatprep.subr.mxu0 %v1923_v29  ;;  %1541 = vmatprep.subr.mxu1 %v1933_v31  ;;  %v2947_v29 = vld [vmem:[#allocation11_spill] sm:$0xff]  ;;  %v2949_v31 = vmov 0.0  }
 0x5da   :  { %1471 = vmatpush1.msra.mxu0 %v1918_v28  ;;  %1542 = vmatpush1.msra.mxu1 %v1928_v30  ;;  %v2946_v28 = vld [vmem:[#allocation9_spill] sm:$0xff]  ;;  %v2948_v30 = vld [vmem:[#allocation8_spill] sm:$0xff] }
 0x5db   :  { %1472 = vmatprep.subr.mxu0 %v1903_v25  ;;  %1543 = vmatprep.subr.mxu1 %v1913_v27  ;;  %v2934_v25 = vld [vmem:[#allocation21_spill] sm:$0xff]  ;;  %v2945_v27 = vld [vmem:[#allocation14_spill] sm:$0xff] }
 0x5dc   :  { %1473 = vmatpush1.msra.mxu0 %v1898_v24  ;;  %1544 = vmatpush1.msra.mxu1 %v1908_v26  ;;  %v2935_v24 = vld [vmem:[#allocation23_spill] sm:$0xff]  ;;  %v2936_v26 = vld [vmem:[#allocation20_spill] sm:$0xff] }
 0x5dd   :  { %1474 = vmatprep.subr.mxu0 %v2837_v21  ;;  %1545 = vmatprep.subr.mxu1 %v1893_v23  ;;  %v2937_v21 = vld [vmem:[#allocation22_spill] sm:$0xff]  ;;  %v2938_v23 = vld [vmem:[#allocation17_spill] sm:$0xff] }
 0x5de   :  { %1475 = vmatpush1.msra.mxu0 %v1878_v20  ;;  %1546 = vmatpush1.msra.mxu1 %v1888_v22  ;;  %v2939_v20 = vld [vmem:[#allocation19_spill] sm:$0xff]  ;;  %v2940_v22 = vld [vmem:[#allocation16_spill] sm:$0xff] }
 0x5df   :  { %1476 = vmatprep.subr.mxu0 %v1863_v17  ;;  %1547 = vmatprep.subr.mxu1 %v1873_v19  ;;  %v2941_v17 = vld [vmem:[#allocation18_spill] sm:$0xff]  ;;  %v2942_v19 = vld [vmem:[#allocation13_spill] sm:$0xff] }
 0x5e0   :  { %1477 = vmatpush1.msra.mxu0 %v1858_v16  ;;  %1548 = vmatpush1.msra.mxu1 %v1868_v18  ;;  %v2943_v16 = vld [vmem:[#allocation15_spill] sm:$0xff]  ;;  %v2944_v18 = vld [vmem:[#allocation12_spill] sm:$0xff] }
 0x5e1   :  { %1478 = vmatprep.subr.mxu0 %v2934_v25  ;;  %1549 = vmatprep.subr.mxu1 %v2935_v24 }
 0x5e2   :  { %1479 = vmatpush1.msra.mxu0 %v2936_v26  ;;  %1550 = vmatpush1.msra.mxu1 %v2937_v21 }
 0x5e3   :  { %1480 = vmatprep.subr.mxu0 %v2938_v23  ;;  %1551 = vmatprep.subr.mxu1 %v2939_v20 }
 0x5e4   :  { %1481 = vmatpush1.msra.mxu0 %v2940_v22  ;;  %1552 = vmatpush1.msra.mxu1 %v2941_v17 }
 0x5e5   :  { %1482 = vmatprep.subr.mxu0 %v2942_v19  ;;  %1553 = vmatprep.subr.mxu1 %v2943_v16 }
 0x5e6   :  { %1483 = vmatpush1.msra.mxu0 %v2944_v18  ;;  %1554 = vmatpush1.msra.mxu1 %v2945_v27 }
 0x5e7   :  { %1484 = vmatprep.subr.mxu0 %v2946_v28  ;;  %1555 = vmatprep.subr.mxu1 %v2947_v29 }
 0x5e8   :  { %1485 = vmatpush1.msra.mxu0 %v2948_v30  ;;  %1518 = vmatprep.mubr.f32.mxu0 %v2949_v31 }
 0x5e9   :  { %1556 = vmatpush1.msra.mxu1 %v2950_v32  ;;  %1589 = vmatprep.mubr.f32.mxu1 %v2949_v31 }
 0x689   :  { %v1349_v34 = vpop.f32.mrf.mxu0  ;;  %v1420_v41 = vpop.f32.mrf.mxu1 }
 0x68a   :  { %v1425_v36 = vadd.f32 %v1665_v33, %v1349_v34  ;;  %v1427_v43 = vadd.f32 %v1667_v40, %v1420_v41 }
 0x68b   :  { %v1351_v37 = vpop.f32.mrf.mxu0  ;;  %v1422_v45 = vpop.f32.mrf.mxu1 }
 0x68c   :  { %v1429_v38 = vmul.f32 0.5, %v1425_v36  ;;  %v1426_v39 = vadd.f32 %v1666_v35, %v1351_v37  ;;  %v1428_v46 = vadd.f32 %v1668_v44, %v1422_v45 }
 0x68e   :  { %1737 = vtanh.f32 %v1429_v38  ;;  %v1433_v42 = vmul.f32 0.5, %v1426_v39  ;;  %v1438_v47 = vmul.f32 0.5, %v1428_v46 }
 0x690   :  { %1739 = vtanh.f32 %v1433_v42 }
 0x691   :  { %1741 = vtanh.f32 %v1427_v43 }
 0x692   :  { %1743 = vtanh.f32 %v1438_v47 }
 0x69b   :  { %v1738_v48 = vpop.eup %1737 }
 0x69c   :  { %v1431_v49 = vmul.f32 0.5, %v1738_v48 }
 0x69d   :  { %v1740_v50 = vpop.eup %1739 }
 0x69e   :  { %v1432_v51 = vadd.f32 0.5, %v1431_v49  ;;  %v1435_v52 = vmul.f32 0.5, %v1740_v50  ;;  %v1742_v54 = vpop.eup %1741 }
 0x69f   :  { %v1744_v58 = vpop.eup %1743 }
 0x6a0   :  { %v1436_v53 = vadd.f32 0.5, %v1435_v52  ;;  %v1443_v56 = vmul.f32 %v1742_v54, %v1432_v51  ;;  %v1440_v59 = vmul.f32 0.5, %v1744_v58 }
 0x6a2   :  { %v1442_v55 = vmul.f32 %v1436_v53, %v2668_v10  ;;  %v1441_v60 = vadd.f32 0.5, %v1440_v59  ;;  %v1673_v10 = vld [vmem:[%s2769_s0 + $0xf8] sm:$0xff] }
 0x6a4   :  { %v1444_v57 = vadd.f32 %v1443_v56, %v1442_v55 }
 0x6a6   :  { %1745 = vtanh.f32 %v1444_v57 }
 0x6b3   :  { %v1746_v62 = vpop.eup %1745 }
 0x6b4   :  { %v1446_v9 = vmul.f32 %v1746_v62, %v1441_v60 }
 0x6b6   :  { %1669 = vst [vmem:[%s2771_s2 + $0x30] sm:$0xff] %v1446_v9  ;;  %1519 = vmatmul.mubr.f32.vlgmr.msra.gmra.mxu0 %v1446_v9  ;;  %1590 = vmatmul.mubr.f32.vlgmr.msra.gmra.mxu1 %v1446_v9 }
 0x776   :  { %v1520_v5 = vpop.f32.mrf.mxu0  ;;  %v1591_v11 = vpop.f32.mrf.mxu1 }
 0x777   :  { %v1596_v6 = vadd.f32 %v1670_v1, %v1520_v5  ;;  %v1598_v12 = vadd.f32 %v1672_v13, %v1591_v11 }
 0x778   :  { %v1522_v61 = vpop.f32.mrf.mxu0  ;;  %v1593_v15 = vpop.f32.mrf.mxu1 }
 0x779   :  { %v1600_v14 = vmul.f32 0.5, %v1596_v6  ;;  %v1597_v3 = vadd.f32 %v1671_v0, %v1522_v61  ;;  %v1599_v8 = vadd.f32 %v1673_v10, %v1593_v15 }
 0x77b   :  { %1747 = vtanh.f32 %v1600_v14  ;;  %v1604_v63 = vmul.f32 0.5, %v1597_v3  ;;  %v1609_v4 = vmul.f32 0.5, %v1599_v8 }
 0x77d   :  { %1749 = vtanh.f32 %v1604_v63 }
 0x77e   :  { %1751 = vtanh.f32 %v1598_v12 }
 0x77f   :  { %1753 = vtanh.f32 %v1609_v4 }
 0x788   :  { %v1748_v7 = vpop.eup %1747 }
 0x789   :  { %v1602_v2 = vmul.f32 0.5, %v1748_v7 }
 0x78a   :  { %v1750_v25 = vpop.eup %1749 }
 0x78b   :  { %v1603_v24 = vadd.f32 0.5, %v1602_v2  ;;  %v1606_v26 = vmul.f32 0.5, %v1750_v25  ;;  %v1752_v23 = vpop.eup %1751 }
 0x78c   :  { %v1754_v19 = vpop.eup %1753 }
 0x78d   :  { %v1607_v21 = vadd.f32 0.5, %v1606_v26  ;;  %v1614_v22 = vmul.f32 %v1752_v23, %v1603_v24  ;;  %v1611_v16 = vmul.f32 0.5, %v1754_v19 }
 0x78f   :  { %v1613_v20 = vmul.f32 %v1607_v21, %v1444_v57  ;;  %v1612_v18 = vadd.f32 0.5, %v1611_v16 }
 0x791   :  { %v1615_v17 = vadd.f32 %v1614_v22, %v1613_v20 }
 0x793   :  { %1755 = vtanh.f32 %v1615_v17 }
 0x7a0   :  { %v1756_v27 = vpop.eup %1755 }
 0x7a1   :  { %v1617_v28 = vmul.f32 %v1756_v27, %v1612_v18 }
 0x7a3   :  { %1674 = vst [vmem:[%s2771_s2 + $0x38] sm:$0xff] %v1617_v28 }
 0x7a4   :  { %1626 = vsyncmov [#allocation5] }
 0x7a7   :  { %s1627_s17 = vpop.sfrf %1626 }
 0x7a8   :  { %p1675_p0 = scmp.ne.s32.totalorder %s1627_s17, 0 }
 0x7aa   :  { %1631 = shalt.err (%p1675_p0)  }

</bundles_post_ra>
